<compile_context>
chip_gen: v6e
topology: v6e:2x2x1
jax: 0.10.0
libtpu: 0.0.40
codegen_flags: <defaults>
</compile_context>

<pallas_src>
import functools

import jax
import jax.numpy as jnp
from jax.experimental import pallas as pl
from jax.experimental.pallas import tpu as pltpu


# --------------------------------------------------------------------------------------
# helpers
# --------------------------------------------------------------------------------------
def _pick_batch_tile(B, rows_per_elem, rows_target=256):
    """Smallest divisor Bt of B with Bt*rows >= rows_target (MXU row occupancy for the
    projection matmuls); otherwise the largest divisor that still leaves >=2 grid
    steps (feeds both v7x TensorCores); falls back to B."""
    divisors = [d for d in range(1, B + 1) if B % d == 0]
    for d in divisors:
        if d * rows_per_elem >= rows_target:
            return d
    multi_step = [d for d in divisors if B // d >= 2]
    return multi_step[-1] if multi_step else B


# --------------------------------------------------------------------------------------
# shared attention core (runs inside the kernels)
# --------------------------------------------------------------------------------------
def _attend_and_project(q, k, v, wp, bp, out_dtype):
    """q: (Bt, M, H, hd) bf16 (qk scale already applied); k, v: (Bt, N, H, hd) bf16;
    wp: (C, C) bf16 == proj.weight.T; bp: (1, C) f32.  Returns (Bt, M, C) out_dtype."""
    Bt, M, H, hd = q.shape
    N = k.shape[1]
    C = H * hd
    # Fold (batch, head) into ONE einsum batch axis -> single-batch-dim matmuls
    # (known-good Mosaic lowering); per-head K=hd contraction is inherent to attention.
    qg = q.transpose(0, 2, 1, 3).reshape(Bt * H, M, hd)
    kg = k.transpose(0, 2, 1, 3).reshape(Bt * H, N, hd)
    vg = v.transpose(0, 2, 1, 3).reshape(Bt * H, N, hd)

    s = jnp.einsum('gmd,gnd->gmn', qg, kg,
                   preferred_element_type=jnp.float32)            # (Bt*H, M, N) f32
    # numerically-stable softmax in f32; divide -> EUP approx reciprocal (free slot)
    s = s - jnp.max(s, axis=-1, keepdims=True)
    p = jnp.exp(s)
    p = p * pl.reciprocal(jnp.sum(p, axis=-1, keepdims=True), approx=True)

    o = jnp.einsum('gmn,gnd->gmd', p.astype(jnp.bfloat16), vg,
                   preferred_element_type=jnp.float32)            # (Bt*H, M, hd) f32
    # head concat: (Bt*H, M, hd) -> (Bt*M, C) lane-dense slab (single relayout)
    o2d = (o.reshape(Bt, H, M, hd).transpose(0, 2, 1, 3)
             .reshape(Bt * M, C).astype(jnp.bfloat16))
    # ONE (R,C)@(C,C) projection matmul, K=C contraction, + bias
    y = jnp.dot(o2d, wp, preferred_element_type=jnp.float32) + bp  # (Bt*M, C) f32
    return y.reshape(Bt, M, C).astype(out_dtype)


# --------------------------------------------------------------------------------------
# kernels
# --------------------------------------------------------------------------------------
def mhsa_self_kernel(x_ref, wqkv_ref, wp_ref, bp_ref, o_ref, *, heads):
    """Self path: fused QKV projection + attention + output projection, Bt batch elems."""
    Bt, N, C = x_ref.shape
    hd = C // heads
    R = Bt * N
    x2d = x_ref[...].reshape(R, C)                                # bf16, lane-dense
    # one lane-dense (R,C)x(C,3C) MXU pass; f32 accumulate, single cast to bf16
    # (cast fuses into the MXU result pop)
    qkv = jnp.dot(x2d, wqkv_ref[...],
                  preferred_element_type=jnp.float32).astype(jnp.bfloat16)   # (R, 3C)
    q = qkv[:, 0 * C:1 * C].reshape(Bt, N, heads, hd)             # scale pre-folded
    k = qkv[:, 1 * C:2 * C].reshape(Bt, N, heads, hd)
    v = qkv[:, 2 * C:3 * C].reshape(Bt, N, heads, hd)
    o_ref[...] = _attend_and_project(q, k, v, wp_ref[...], bp_ref[...], o_ref.dtype)


def mhsa_cross_kernel(q_ref, k_ref, v_ref, wp_ref, bp_ref, o_ref, *, heads):
    """Cross path: q/k/v supplied externally as lane-dense (Bt, L, C) bf16 slabs."""
    Bt, M, C = q_ref.shape
    N = k_ref.shape[1]
    hd = C // heads
    q = q_ref[...].reshape(Bt, M, heads, hd)                      # scale pre-folded
    k = k_ref[...].reshape(Bt, N, heads, hd)
    v = v_ref[...].reshape(Bt, N, heads, hd)
    o_ref[...] = _attend_and_project(q, k, v, wp_ref[...], bp_ref[...], o_ref.dtype)


# --------------------------------------------------------------------------------------
# wrappers (PyTorch-layout params in, pallas_call plumbing)
# --------------------------------------------------------------------------------------
def mhsa_self(x, w_qkv, w_proj, b_proj, heads, out_dtype=jnp.float32):
    """MultiHeadSelfAttention.forward(query) path.

    x:      (B, N, C) f32
    w_qkv:  (3C, C) f32  -- nn.Linear(C, 3C, bias=False).weight layout
    w_proj: (C, C)  f32  -- nn.Linear(C, C).weight layout
    b_proj: (C,)    f32
    out_dtype: pass jnp.bfloat16 to halve writeback if downstream tolerates it.
    """
    B, N, C = x.shape
    hd = C // heads
    scale = hd ** (-0.5)

    # fused (C, 3C) QKV weight; fold qk scale into the q columns (exact: no qkv bias)
    wt = w_qkv.T                                                   # (C, 3C): x @ wt
    wqkv = jnp.concatenate([wt[:, :C] * scale, wt[:, C:]], axis=1).astype(jnp.bfloat16)
    wp = w_proj.T.astype(jnp.bfloat16)                             # (C, C)
    bp = b_proj.reshape(1, C).astype(jnp.float32)
    x_bf = x.astype(jnp.bfloat16)                                  # cast once in wrapper

    Bt = _pick_batch_tile(B, N)
    kern = functools.partial(mhsa_self_kernel, heads=heads)
    return pl.pallas_call(
        kern,
        grid=(B // Bt,),
        in_specs=[
            pl.BlockSpec((Bt, N, C), lambda b: (b, 0, 0)),
            pl.BlockSpec((C, 3 * C), lambda b: (0, 0)),
            pl.BlockSpec((C, C), lambda b: (0, 0)),
            pl.BlockSpec((1, C), lambda b: (0, 0)),
        ],
        out_specs=pl.BlockSpec((Bt, N, C), lambda b: (b, 0, 0)),
        out_shape=jax.ShapeDtypeStruct((B, N, C), out_dtype),
        compiler_params=pltpu.CompilerParams(dimension_semantics=("parallel",)),
    )(x_bf, wqkv, wp, bp)


def mhsa_cross(query, key, value, w_proj, b_proj, heads, out_dtype=jnp.float32):
    """MultiHeadSelfAttention.forward(query, key, value) path (q/k/v not re-projected)."""
    B, M, C = query.shape
    _, N, _ = key.shape
    hd = C // heads
    scale = hd ** (-0.5)

    # keep q/k/v lane-dense (B, L, C); heads split in-kernel. The qk scale is fused
    # into the (required) bf16 cast of q -- one fused elementwise pass in the wrapper.
    qh = (query * scale).astype(jnp.bfloat16)
    kh = key.astype(jnp.bfloat16)
    vh = value.astype(jnp.bfloat16)
    wp = w_proj.T.astype(jnp.bfloat16)                             # (C, C)
    bp = b_proj.reshape(1, C).astype(jnp.float32)

    Bt = _pick_batch_tile(B, M)
    kern = functools.partial(mhsa_cross_kernel, heads=heads)
    return pl.pallas_call(
        kern,
        grid=(B // Bt,),
        in_specs=[
            pl.BlockSpec((Bt, M, C), lambda b: (b, 0, 0)),
            pl.BlockSpec((Bt, N, C), lambda b: (b, 0, 0)),
            pl.BlockSpec((Bt, N, C), lambda b: (b, 0, 0)),
            pl.BlockSpec((C, C), lambda b: (0, 0)),
            pl.BlockSpec((1, C), lambda b: (0, 0)),
        ],
        out_specs=pl.BlockSpec((Bt, M, C), lambda b: (b, 0, 0)),
        out_shape=jax.ShapeDtypeStruct((B, M, C), out_dtype),
        compiler_params=pltpu.CompilerParams(dimension_semantics=("parallel",)),
    )(qh, kh, vh, wp, bp)


# --------------------------------------------------------------------------------------
# pure-JAX references (exact PyTorch semantics, f32) for a sanity check
# --------------------------------------------------------------------------------------
def mhsa_self_reference(x, w_qkv, w_proj, b_proj, heads):
    B, N, C = x.shape
    hd = C // heads
    scale = hd ** (-0.5)
    qkv = (x @ w_qkv.T).reshape(B, N, 3, heads, hd).transpose(2, 0, 3, 1, 4)
    q, k, v = qkv[0], qkv[1], qkv[2]
    attn = jnp.einsum('bhmd,bhnd->bhmn', q, k) * scale
    attn = jax.nn.softmax(attn, axis=-1)
    o = jnp.einsum('bhmn,bhnd->bhmd', attn, v).transpose(0, 2, 1, 3).reshape(B, N, C)
    return o @ w_proj.T + b_proj


def mhsa_cross_reference(query, key, value, w_proj, b_proj, heads):
    B, N, C = key.shape
    M = query.shape[1]
    hd = C // heads
    scale = hd ** (-0.5)
    q = query.reshape(B, M, heads, hd).transpose(0, 2, 1, 3)
    k = key.reshape(B, N, heads, hd).transpose(0, 2, 1, 3)
    v = value.reshape(B, N, heads, hd).transpose(0, 2, 1, 3)
    attn = jnp.einsum('bhmd,bhnd->bhmn', q, k) * scale
    attn = jax.nn.softmax(attn, axis=-1)
    o = jnp.einsum('bhmn,bhnd->bhmd', attn, v).transpose(0, 2, 1, 3).reshape(B, M, C)
    return o @ w_proj.T + b_proj


if __name__ == "__main__":
    # small but lane-dense shapes: C multiple of 128 keeps every store unmasked
    B, N, C, heads = 2, 8, 128, 8          # head_dim = 16
    key0 = jax.random.PRNGKey(0)
    kx, kq, kk, kv, kw1, kw2, kb = jax.random.split(key0, 7)

    x = jax.random.normal(kx, (B, N, C), jnp.float32)
    w_qkv = 0.02 * jax.random.normal(kw1, (3 * C, C), jnp.float32)   # torch Linear weight layout
    w_proj = 0.02 * jax.random.normal(kw2, (C, C), jnp.float32)
    b_proj = 0.01 * jax.random.normal(kb, (C,), jnp.float32)

    # self-attention path (query only)
    out_self = mhsa_self(x, w_qkv, w_proj, b_proj, heads)
    ref_self = mhsa_self_reference(x, w_qkv, w_proj, b_proj, heads)

    # cross path (query, key, value all provided; query length differs from kv length)
    M = 16
    query = jax.random.normal(kq, (B, M, C), jnp.float32)
    key_t = jax.random.normal(kk, (B, N, C), jnp.float32)
    value = jax.random.normal(kv, (B, N, C), jnp.float32)
    out_cross = mhsa_cross(query, key_t, value, w_proj, b_proj, heads)
    ref_cross = mhsa_cross_reference(query, key_t, value, w_proj, b_proj, heads)

    jax.block_until_ready((out_self, out_cross))
    assert out_self.shape == (B, N, C)
    assert out_cross.shape == (B, M, C)
    # loose tolerance: matmuls run in bf16 with f32 accumulation + approx reciprocal softmax
    assert float(jnp.max(jnp.abs(out_self - ref_self))) < 2e-2
    assert float(jnp.max(jnp.abs(out_cross - ref_cross))) < 2e-2
    print("KERNEL_OK")
</pallas_src>

<mosaic_0001>
module attributes {stable_mosaic.version = 11 : i64} {
  func.func @mhsa_self_kernel(%arg0: i32, %arg1: memref<1x8x128xbf16, #tpu.memory_space<vmem>>, %arg2: memref<128x384xbf16, #tpu.memory_space<vmem>>, %arg3: memref<128x128xbf16, #tpu.memory_space<vmem>>, %arg4: memref<1x128xf32, #tpu.memory_space<vmem>>, %arg5: memref<1x8x128xf32, #tpu.memory_space<vmem>>) attributes {dimension_semantics = [#tpu.dimension_semantics<parallel>], iteration_bounds = array<i64: 2>, scalar_prefetch = 0 : i64, scratch_operands = 0 : i64, tpu.core_type = #tpu.core_type<tc>, window_params = [{transform_indices = @transform_0, window_bounds = array<i64: 1, 8, 128>}, {pipeline_mode = #tpu.pipeline_mode<synchronous>, transform_indices = @transform_1, window_bounds = array<i64: 128, 384>}, {pipeline_mode = #tpu.pipeline_mode<synchronous>, transform_indices = @transform_2, window_bounds = array<i64: 128, 128>}, {pipeline_mode = #tpu.pipeline_mode<synchronous>, transform_indices = @transform_3, window_bounds = array<i64: 1, 128>}, {transform_indices = @transform_4, window_bounds = array<i64: 1, 8, 128>}]} {
    %c0 = arith.constant 0 : index
    %c0_0 = arith.constant 0 : index
    %c0_1 = arith.constant 0 : index
    %0 = vector.load %arg1[%c0, %c0_0, %c0_1] : memref<1x8x128xbf16, #tpu.memory_space<vmem>>, vector<1x8x128xbf16>
    %1 = vector.shape_cast %0 : vector<1x8x128xbf16> to vector<8x128xbf16>
    %c0_2 = arith.constant 0 : index
    %c0_3 = arith.constant 0 : index
    %2 = vector.load %arg2[%c0_2, %c0_3] : memref<128x384xbf16, #tpu.memory_space<vmem>>, vector<128x384xbf16>
    %cst = arith.constant dense<0.000000e+00> : vector<8x384xf32>
    %3 = tpu.matmul %1, %2, %cst {dimension_numbers = #tpu.dot_dimension_numbers<[1], [0], [0], [1], [0, 0, 1, 1], [], []>} : vector<8x128xbf16>, vector<128x384xbf16>, vector<8x384xf32> -> vector<8x384xf32>
    %4 = arith.truncf %3 : vector<8x384xf32> to vector<8x384xbf16>
    %5 = vector.extract_strided_slice %4 {offsets = [0, 0], sizes = [8, 128], strides = [1, 1]} : vector<8x384xbf16> to vector<8x128xbf16>
    %6 = vector.shape_cast %5 : vector<8x128xbf16> to vector<1x8x8x16xbf16>
    %7 = vector.extract_strided_slice %4 {offsets = [0, 128], sizes = [8, 128], strides = [1, 1]} : vector<8x384xbf16> to vector<8x128xbf16>
    %8 = vector.shape_cast %7 : vector<8x128xbf16> to vector<1x8x8x16xbf16>
    %9 = vector.extract_strided_slice %4 {offsets = [0, 256], sizes = [8, 128], strides = [1, 1]} : vector<8x384xbf16> to vector<8x128xbf16>
    %10 = vector.shape_cast %9 : vector<8x128xbf16> to vector<1x8x8x16xbf16>
    %c0_4 = arith.constant 0 : index
    %c0_5 = arith.constant 0 : index
    %11 = vector.load %arg3[%c0_4, %c0_5] : memref<128x128xbf16, #tpu.memory_space<vmem>>, vector<128x128xbf16>
    %c0_6 = arith.constant 0 : index
    %c0_7 = arith.constant 0 : index
    %12 = vector.load %arg4[%c0_6, %c0_7] : memref<1x128xf32, #tpu.memory_space<vmem>>, vector<1x128xf32>
    %13 = tpu.transpose %6, [0, 2, 1, 3] : vector<1x8x8x16xbf16> -> vector<1x8x8x16xbf16>
    %14 = vector.shape_cast %13 : vector<1x8x8x16xbf16> to vector<8x8x16xbf16>
    %15 = tpu.transpose %8, [0, 2, 1, 3] : vector<1x8x8x16xbf16> -> vector<1x8x8x16xbf16>
    %16 = vector.shape_cast %15 : vector<1x8x8x16xbf16> to vector<8x8x16xbf16>
    %17 = tpu.transpose %10, [0, 2, 1, 3] : vector<1x8x8x16xbf16> -> vector<1x8x8x16xbf16>
    %18 = vector.shape_cast %17 : vector<1x8x8x16xbf16> to vector<8x8x16xbf16>
    "tpu.trace_start"() <{level = 10 : i32, message = "gmd,gnd->gmn"}> : () -> ()
    %cst_8 = arith.constant dense<0.000000e+00> : vector<8x8x8xf32>
    %19 = tpu.matmul %14, %16, %cst_8 {dimension_numbers = #tpu.dot_dimension_numbers<[2], [2], [1], [1], [0, 0, 0, 1, 1, 1], [0], [0]>} : vector<8x8x16xbf16>, vector<8x8x16xbf16>, vector<8x8x8xf32> -> vector<8x8x8xf32>
    "tpu.trace_stop"() : () -> ()
    %cst_9 = arith.constant dense<0xFF800000> : vector<8x8xf32>
    %20 = vector.multi_reduction <maximumf>, %19, %cst_9 [2] : vector<8x8x8xf32> to vector<8x8xf32>
    %21 = vector.shape_cast %20 : vector<8x8xf32> to vector<8x8x1xf32>
    %22 = vector.broadcast %21 : vector<8x8x1xf32> to vector<8x8x8xf32>
    %23 = arith.subf %19, %22 : vector<8x8x8xf32>
    %24 = math.exp %23 : vector<8x8x8xf32>
    %cst_10 = arith.constant dense<0.000000e+00> : vector<8x8xf32>
    %25 = vector.multi_reduction <add>, %24, %cst_10 [2] : vector<8x8x8xf32> to vector<8x8xf32>
    %26 = vector.shape_cast %25 : vector<8x8xf32> to vector<8x8x1xf32>
    %27 = tpu.reciprocal %26 {approx = true} : vector<8x8x1xf32> -> vector<8x8x1xf32>
    %28 = vector.broadcast %27 : vector<8x8x1xf32> to vector<8x8x8xf32>
    %29 = arith.mulf %24, %28 : vector<8x8x8xf32>
    %30 = arith.truncf %29 : vector<8x8x8xf32> to vector<8x8x8xbf16>
    "tpu.trace_start"() <{level = 10 : i32, message = "gmn,gnd->gmd"}> : () -> ()
    %cst_11 = arith.constant dense<0.000000e+00> : vector<8x8x16xf32>
    %31 = tpu.matmul %30, %18, %cst_11 {dimension_numbers = #tpu.dot_dimension_numbers<[2], [1], [1], [2], [0, 0, 0, 1, 1, 2], [0], [0]>} : vector<8x8x8xbf16>, vector<8x8x16xbf16>, vector<8x8x16xf32> -> vector<8x8x16xf32>
    "tpu.trace_stop"() : () -> ()
    %32 = vector.shape_cast %31 : vector<8x8x16xf32> to vector<1x8x8x16xf32>
    %33 = tpu.transpose %32, [0, 2, 1, 3] : vector<1x8x8x16xf32> -> vector<1x8x8x16xf32>
    %34 = vector.shape_cast %33 : vector<1x8x8x16xf32> to vector<8x128xf32>
    %35 = arith.truncf %34 : vector<8x128xf32> to vector<8x128xbf16>
    %cst_12 = arith.constant dense<0.000000e+00> : vector<8x128xf32>
    %36 = tpu.matmul %35, %11, %cst_12 {dimension_numbers = #tpu.dot_dimension_numbers<[1], [0], [0], [1], [0, 0, 1, 1], [], []>} : vector<8x128xbf16>, vector<128x128xbf16>, vector<8x128xf32> -> vector<8x128xf32>
    %37 = vector.broadcast %12 : vector<1x128xf32> to vector<8x128xf32>
    %38 = arith.addf %36, %37 : vector<8x128xf32>
    %39 = vector.shape_cast %38 : vector<8x128xf32> to vector<1x8x128xf32>
    %c0_13 = arith.constant 0 : index
    %c0_14 = arith.constant 0 : index
    %c0_15 = arith.constant 0 : index
    %40 = vector.load %arg5[%c0_13, %c0_14, %c0_15] : memref<1x8x128xf32, #tpu.memory_space<vmem>>, vector<1x8x128xf32>
    tpu.vector_store %arg5[%c0_13, %c0_14, %c0_15], %39 {strides = array<i32>} : memref<1x8x128xf32, #tpu.memory_space<vmem>>, vector<1x8x128xf32>,
    return
  }
  func.func @transform_0(%arg0: i32) -> (i32, i32, i32) {
    %c0_i32 = arith.constant 0 : i32
    %c0_i32_0 = arith.constant 0 : i32
    %c0_i32_1 = arith.constant 0 : i32
    return %arg0, %c0_i32, %c0_i32_0 : i32, i32, i32
  }
  func.func @transform_1(%arg0: i32) -> (i32, i32) {
    %c0_i32 = arith.constant 0 : i32
    %c0_i32_0 = arith.constant 0 : i32
    %c0_i32_1 = arith.constant 0 : i32
    return %c0_i32, %c0_i32_0 : i32, i32
  }
  func.func @transform_2(%arg0: i32) -> (i32, i32) {
    %c0_i32 = arith.constant 0 : i32
    %c0_i32_0 = arith.constant 0 : i32
    %c0_i32_1 = arith.constant 0 : i32
    return %c0_i32, %c0_i32_0 : i32, i32
  }
  func.func @transform_3(%arg0: i32) -> (i32, i32) {
    %c0_i32 = arith.constant 0 : i32
    %c0_i32_0 = arith.constant 0 : i32
    %c0_i32_1 = arith.constant 0 : i32
    return %c0_i32, %c0_i32_0 : i32, i32
  }
  func.func @transform_4(%arg0: i32) -> (i32, i32, i32) {
    %c0_i32 = arith.constant 0 : i32
    %c0_i32_0 = arith.constant 0 : i32
    %c0_i32_1 = arith.constant 0 : i32
    return %arg0, %c0_i32, %c0_i32_0 : i32, i32, i32
  }
}

</mosaic_0001>

<bundles_post_ra>
// kernel: tpu_custom_call.1
= control target key start
LH: loop header
LB: loop body
LE: loop exit
PB: predicated region body
PF: predicated region fallthrough
CT: control target
= control target key end

     0   :  { %9 = vsyncpa [#allocation3], 0  ;;  %s3646_s0 = inlined_call_operand.hbm [shape: bf16[2,8,128], index: 0, kind: input, shape index: {}]   ;;  %s3647_s1 = inlined_call_operand.hbm [shape: bf16[128,384], index: 1, kind: input, shape index: {}]   ;;  %s3648_s2 = inlined_call_operand.hbm [shape: bf16[128,128], index: 2, kind: input, shape index: {}]   ;;  %s3649_s3 = inlined_call_operand.vmem [shape: f32[1,128], index: 3, kind: input, shape index: {}]   ;;  %s3650_s4 = inlined_call_operand.hbm [shape: f32[2,8,128], index: 4, kind: output, shape index: {}]  }
   0x1   :  { %11 = vsyncpa [#allocation3 + $0x1], 0 }
   0x2   :  { %12 = vsyncpa [#allocation6], 0 }
   0x3   :  { %13 = vsyncpa [#allocation4], 0 }
   0x4   :  { %15 = vsyncpa [#allocation4 + $0x1], 0  ;;  %s3103_s15 = smov 0   ;;  %s3105_s16 = smov 0  }
   0x5   :  { %s3107_s17 = smov 0   ;;  %s3109_s18 = smov 0  }
   0x6 LB: > { %s3124_s19 = sadd.s32 4294967295, %s3056_s18   ;;  %s2494_s20 = sadd.s32 4294967294, %s3056_s18   ;;  %s3056_s18 = sphi %s3109_s18, %s3672_s18   ;;  %s3052_s17 = sphi %s3107_s17, %s3671_s17   ;;  %s3048_s16 = sphi %s3105_s16, %s3670_s16   ;;  %s3044_s15 = sphi %s3103_s15, %s3669_s15  }
   0x7   : > { %p41_p0 = scmp.ne.s32.totalorder %s3048_s16, %s3044_s15  ;;  %p3651_p1 = scmp.eq.s32.totalorder %s3124_s19, 0 }
   0x8   : > { %p134_p3 = scmp.eq.s32.totalorder %s2494_s20, 1  ;;  %p2495_p5 = scmp.ge.s32.totalorder %s3056_s18, 1 }
   0x9   : > { %p3133_p4 = por %p3651_p1, %p41_p0  ;;  %p141_p7 = scmp.lt.s32.totalorder %s3056_s18, 3 }
   0xa   : > { %p3138_p6 = por %p134_p3, %p41_p0  ;;  %s3058_s24 = smov [#allocation5]  }
   0xb   : > { %s3655_s21 = scalar_select %p3133_p4, 1, 0 }
   0xc   : > { %s3656_s22 = scalar_select %p3138_p6, 1, 0 }
   0xd   : > { %p3143_p8 = pnand %p2495_p5, %p141_p7  ;;  %s153_s25 = sshll.u32 %s3058_s24, 4  ;;  %s154_s25 = int_to_ptr.vmem [resolvable:$true] %s153_s25 }
   0xe   : > { %s3059_s27 = smov [#allocation7]   ;;  %s2919_s29 = scalar_lea.vmem %s154_s25, 3072 }
   0xf   : > { %s3657_s23 = scalar_select %p3143_p8, 1, 0 }
  0x10   : > { %p2765_p9 = pneg %p3143_p8  ;;  %s166_s28 = sshll.u32 %s3059_s27, 4  ;;  %s167_s28 = int_to_ptr.vmem [resolvable:$true] %s166_s28 }
  0x11   : > { %p2920_p13 = scmp.ne.s32.totalorder %s154_s25, %s2919_s29  ;;  %p2927_p5 = scmp.lt.s32.totalorder %s154_s25, %s154_s25 }
  0x12   : > { %p3152_p11 = pnand %p2765_p9, %p3651_p1  ;;  %p2928_p7 = scmp.lt.s32.totalorder %s2919_s29, %s2919_s29 }
  0x14   : > { %p2910_p12 = pneg %p3152_p11  ;;  %p2929_p10 = por %p2928_p7, %p2927_p5 }
  0x16   : > { %p2922_p0 = pnand %p2920_p13, %p2910_p12 }
  0x18   : > { %p2923_p3 = pneg %p2922_p0 }
  0x1a   : > { %p2930_p9 = pnand %p2929_p10, %p2923_p3 }
  0x1c   : > { %2933 = shalt.err (!%p2930_p9)
}
  0x1d   : > { %s3060_s30 = smov 192   ;;  %s3061_s5 = smov 12  }
  0x1e   : > { %2768 = dma.hbm_to_vmem [thread:$0]  (!%p3152_p11), %s3647_s1, 3072, %s154_s25, [#allocation6], %s3060_s30, %s3060_s30, %s3061_s5  }
  0x1f   : > { %s2945_s8 = scalar_lea.vmem %s167_s28, 1024  ;;  %p2953_p2 = scmp.lt.s32.totalorder %s167_s28, %s167_s28 }
  0x20   : > { %p2946_p1 = scmp.ne.s32.totalorder %s167_s28, %s2945_s8  ;;  %p2954_p6 = scmp.lt.s32.totalorder %s2945_s8, %s2945_s8 }
  0x22   : > { %p2948_p13 = pnand %p2946_p1, %p2910_p12  ;;  %p2955_p5 = por %p2954_p6, %p2953_p2 }
  0x24   : > { %p2949_p0 = pneg %p2948_p13 }
  0x26   : > { %p2956_p10 = pnand %p2955_p5, %p2949_p0 }
  0x28   : > { %2959 = shalt.err (!%p2956_p10)
}
  0x29   : > { %s3062_s9 = smov 64   ;;  %s3063_s10 = smov 4  }
  0x2a   : > { %2771 = dma.hbm_to_vmem [thread:$0]  (!%p3152_p11), %s3648_s2, 1024, %s167_s28, [#allocation6], %s3062_s9, %s3062_s9, %s3063_s10  }
  0x2b   : > { %s3175_s13 = sadd.s32 1, %s3056_s18   ;;  %s28_s20 = sadd.s32 1, %s3052_s17 }
  0x2c   : > { %s25_s14 = ssub.s32 %s3056_s18, %s3175_s13  ;;  %p35_p2 = scmp.ne.s32.totalorder %s3052_s17, %s3048_s16 }
  0x2d   : > { %p26_p1 = scmp.eq.s32.totalorder %s25_s14, 0  ;;  %p36_p6 = scmp.eq.s32.totalorder %s3056_s18, 0 }
  0x2e   : > { %p3659_p3 = scmp.eq.s32.totalorder %s3124_s19, 1  ;;  %p2782_p9 = scmp.lt.s32.totalorder %s3056_s18, 2 }
  0x2f   : > { %s3184_s24 = scalar_select %p26_p1, %s3052_s17, %s28_s20  }
  0x30   : > { %p37_p12 = por %p36_p6, %p35_p2  ;;  %p3188_p7 = por %p3659_p3, %p35_p2 }
  0x31   : > { %s183_s26 = sand.u32 1, %s3052_s17   ;;  %s2500_s28 = sshll.u32 %s3056_s18, 6 }
  0x32   : > { %s3660_s25 = scalar_select %p3188_p7, 1, 0 }
  0x33   : > { %s2499_s27 = sshll.u32 %s183_s26, 2  ;;  %s3198_s5 = scalar_lea.hbm %s3646_s0, %s2500_s28 }
  0x34   : > { %s187_s6 = scalar_lea.vmem [#allocation2], %s2499_s27  ;;  %p3200_p11 = pnand %p2782_p9, %p37_p12 }
  0x35   : > { %s194_s7 = sshll.u32 %s187_s6, 4  ;;  %s184_s9 = scalar_lea.sflag [#allocation3], %s183_s26  ;;  %s195_s7 = int_to_ptr.vmem [resolvable:$true] %s194_s7 }
  0x36   : > { %s2960_s10 = scalar_lea.hbm %s3198_s5, 64  ;;  %p2962_p0 = pneg %p3200_p11 }
  0x37   : > { %p2961_p13 = scmp.ne.s32.totalorder %s3198_s5, %s2960_s10  ;;  %s2965_s14 = scalar_lea.hbm %s3646_s0, 128 }
  0x38   : > { %p2966_p1 = scmp.lt.s32.totalorder %s3198_s5, %s3646_s0  ;;  %p2967_p2 = scmp.lt.s32.totalorder %s2965_s14, %s2960_s10 }
  0x39   : > { %p2963_p5 = pnand %p2962_p0, %p2961_p13 }
  0x3a   : > { %p2968_p6 = por %p2967_p2, %p2966_p1 }
  0x3b   : > { %p2964_p10 = pneg %p2963_p5 }
  0x3d   : > { %p2969_p12 = pnand %p2968_p6, %p2964_p10 }
  0x3f   : > { %2972 = shalt.err (!%p2969_p12)
}
  0x40   : > { %s2973_s28 = scalar_lea.vmem %s195_s7, 64  ;;  %s3064_s26 = smov [#allocation2]  }
  0x41   : > { %p2974_p3 = scmp.ne.s32.totalorder %s195_s7, %s2973_s28  ;;  %s2978_s29 = sshll.u32 %s3064_s26, 4  ;;  %s2979_s29 = int_to_ptr.vmem [resolvable:$false] %s2978_s29 }
  0x42   : > { %s2980_s30 = scalar_lea.vmem %s2979_s29, 128  ;;  %p2981_p13 = scmp.lt.s32.totalorder %s195_s7, %s2979_s29 }
  0x43   : > { %p2976_p9 = pnand %p2974_p3, %p2962_p0  ;;  %p2982_p5 = scmp.lt.s32.totalorder %s2980_s30, %s2973_s28 }
  0x45   : > { %p2977_p7 = pneg %p2976_p9  ;;  %p2983_p4 = por %p2982_p5, %p2981_p13 }
  0x47   : > { %p2984_p8 = pnand %p2983_p4, %p2977_p7 }
  0x49   : > { %2987 = shalt.err (!%p2984_p8)
}
  0x4a   : > { %2775 = dma.hbm_to_vmem [thread:$0]  (!%p3200_p11), %s3198_s5, 64, %s195_s7, %s184_s9  }
  0x4b   : > { %p3662_p10 = scmp.ne.s32.totalorder %s3657_s23, 0 }
  0x4c   : > { %s3221_s6 = sand.u32 (!%p3662_p10), 1, %s3048_s16   ;;  %p3663_p0 = scmp.ne.s32.totalorder (!%p3662_p10), %s3655_s21, 0 }
  0x4d   : > { %203 = sbr.rel (%p3662_p10) target bundleno = 1573 (0x625), region = 36  ;;  %s2502_s10 = sshll.u32 (!%p3662_p10), %s3221_s6, 2 }
  0x4e   : > { %s206_s11 = scalar_lea.sflag (!%p3662_p10), [#allocation3], %s3221_s6  ;;  %s3225_s12 = scalar_lea.vmem (!%p3662_p10), [#allocation2], %s2502_s10 }
  0x52   : > { %3031 = dma.done.wait (%p3663_p0), %s206_s11, 64  }
  0x53   : > { %3033 = vsyncadd (%p3663_p0), %s206_s11, 4294967232  ;;  %p3664_p4 = scmp.eq.s32.totalorder %s3124_s19, 0 }
  0x55   : > { %3035 = dma.done.wait (%p3664_p4), [#allocation6], 4096   ;;  %p3665_p8 = pmov %p3664_p4 }
  0x56   : > { %v3065_v0 = vmov 0   ;;  %v2836_v1 = vld [vmem:[#allocation5 + $0xac] ss:$12 sps:$4 sm:$0xff]   ;;  %v2838_v2 = vld [vmem:[#allocation5 + $0xa8] ss:$12 sps:$4 sm:$0xff]   ;;  %v3066_v18 = vmov 0.0   ;;  %v514_v39 = vlaneseq }
  0x57   : > { %3037 = vsyncadd (%p3665_p8), [#allocation6], 4294963200  ;;  %436 = vmatprep.mubr.bf16.mxu0 %v3065_v0  ;;  %404 = vmatprep.subr.bf16.mxu0 %v2836_v1  ;;  %v2839_v3 = vld [vmem:[#allocation5 + $0x94] ss:$12 sps:$4 sm:$0xff]   ;;  %v2841_v4 = vld [vmem:[#allocation5 + $0x90] ss:$12 sps:$4 sm:$0xff]  }
  0x58   : > { %405 = vmatpush1.bf16.msra.mxu0 %v2838_v2  ;;  %v2842_v5 = vld [vmem:[#allocation5 + $0x7c] ss:$12 sps:$4 sm:$0xff]   ;;  %v2844_v6 = vld [vmem:[#allocation5 + $0x78] ss:$12 sps:$4 sm:$0xff]   ;;  %v2847_v8 = vld [vmem:[#allocation5 + $0x60] ss:$12 sps:$4 sm:$0xff]   ;;  %2617 = vmatprep.subr.bf16.mxu1 %v3066_v18 }
  0x59   : > { %406 = vmatprep.subr.bf16.mxu0 %v2839_v3  ;;  %v2845_v7 = vld [vmem:[#allocation5 + $0x64] ss:$12 sps:$4 sm:$0xff]   ;;  %v2848_v9 = vld [vmem:[#allocation5 + $0x4c] ss:$12 sps:$4 sm:$0xff]   ;;  %v2850_v10 = vld [vmem:[#allocation5 + $0x48] ss:$12 sps:$4 sm:$0xff]  }
  0x5a   : > { %v2851_v11 = vld [vmem:[#allocation5 + $0x34] ss:$12 sps:$4 sm:$0xff]   ;;  %v2853_v12 = vld [vmem:[#allocation5 + $0x30] ss:$12 sps:$4 sm:$0xff]   ;;  %v2856_v14 = vld [vmem:[#allocation5 + $0x18] ss:$12 sps:$4 sm:$0xff]  }
  0x5b   : > { %v2854_v13 = vld [vmem:[#allocation5 + $0x1c] ss:$12 sps:$4 sm:$0xff]   ;;  %v2857_v15 = vld [vmem:[#allocation5 + $0x4] ss:$12 sps:$4 sm:$0xff]   ;;  %v2859_v16 = vld [vmem:[#allocation5] ss:$12 sps:$4 sm:$0xff]  }
  0x5c   : > { %407 = vmatpush1.bf16.msra.mxu0 %v2841_v4  ;;  %v243_v17 = vld [vmem:[%s3225_s12] sm:$0xf]  ;;  %v2862_v21 = vld [vmem:[#allocation5 + $0x80] ss:$12 sps:$4 sm:$0xff]   ;;  %s3067_s21 = smov 96   ;;  %s3068_s23 = smov 112  }
  0x5d   : > { %408 = vmatprep.subr.bf16.mxu0 %v2842_v5  ;;  %v2860_v19 = vld [vmem:[#allocation5 + $0xb0] ss:$12 sps:$4 sm:$0xff]   ;;  %v2861_v20 = vld [vmem:[#allocation5 + $0x98] ss:$12 sps:$4 sm:$0xff]   ;;  %v2863_v27 = vld [vmem:[#allocation5 + $0x68] ss:$12 sps:$4 sm:$0xff]  }
  0x5e   : > { %2618 = vmatpush3.bf16.msra.mxu1 %v2860_v19  ;;  %s3069_s5 = smov 80   ;;  %v2864_v29 = vld [vmem:[#allocation5 + $0x50] ss:$12 sps:$4 sm:$0xff]   ;;  %s3070_s7 = smov 64   ;;  %v2865_v30 = vld [vmem:[#allocation5 + $0x38] ss:$12 sps:$4 sm:$0xff]  }
  0x5f   : > { %2619 = vmatprep.subr.bf16.mxu1 %v3066_v18  ;;  %s3071_s8 = smov 48   ;;  %s3072_s9 = smov 32   ;;  %v2866_v31 = vld [vmem:[#allocation5 + $0x20] ss:$12 sps:$4 sm:$0xff]   ;;  %v2867_v32 = vld [vmem:[#allocation5 + $0x8] ss:$12 sps:$4 sm:$0xff]  }
  0x60   : > { %409 = vmatpush1.bf16.msra.mxu0 %v2844_v6  ;;  %s3073_s14 = smov 16   ;;  %vm3074_vm0 = vmmov 0   ;;  %v3075_v37 = vmov 1983009808   ;;  %v3076_v42 = vmov 1934713408  }
  0x61   : > { %410 = vmatprep.subr.bf16.mxu0 %v2845_v7  ;;  %2633 = vmatprep.mubr.msk.bf16.mxu1 %vm3074_vm0, %v3066_v18  ;;  %v512_v38 = vunpack.c.l.s4 %v3075_v37  ;;  %v529_v43 = vunpack.c.l.s4 %v3076_v42  ;;  %v515_v45 = vshrl.u32 %v514_v39, 7  ;;  %vm1147_vm1 = vcmask 130048   ;;  %s2505_s20 = sshll.u32 %s3221_s6, 3  ;;  %s2564_s26 = sshll.u32 %s3124_s19, 7 }
  0x62   : > { %2620 = vmatpush3.bf16.msra.mxu1 %v2861_v20  ;;  %vm1516_vm2 = vcmask 64512   ;;  %vm1616_vm3 = vcmask 1043456   ;;  %vm2283_vm4 = vcmask 261120   ;;  %vm2285_vm5 = vcmask 392192   ;;  %s241_s29 = scalar_lea.vmem [#allocation8], %s2505_s20  ;;  %s3603_s12 = scalar_lea.hbm %s3650_s4, %s2564_s26 }
  0x63   : > { %2621 = vmatprep.subr.bf16.mxu1 %v3066_v18  ;;  %v513_v44 = vunpack.c.0.s8 %v512_v38  ;;  %v530_v48 = vunpack.c.0.s8 %v529_v43  ;;  %vm2287_vm6 = vcmask 523264   ;;  %vm2289_vm7 = vcmask 654336   ;;  %s2405_s30 = sshll.u32 %s241_s29, 4  ;;  %p3666_p11 = scmp.ne.s32.totalorder %s3660_s25, 0  ;;  %s3605_s30 = int_to_ptr.vmem [resolvable:$true] %s2405_s30 }
  0x64   : > { %411 = vmatpush1.bf16.msra.mxu0 %v2847_v8  ;;  %vm2291_vm8 = vcmask 785408   ;;  %vm2293_vm9 = vcmask 916480   ;;  %s3077_s19 = smov [#allocation8]  }
  0x65   : > { %412 = vmatprep.subr.bf16.mxu0 %v2848_v9  ;;  %v3291_v49 = vsub.s32 %v513_v44, %v515_v45  ;;  %v3294_v56 = vsub.s32 %v530_v48, %v515_v45 }
  0x66   : > { %2622 = vmatpush3.bf16.msra.mxu1 %v2862_v21 }
  0x67   : > { %2623 = vmatprep.subr.bf16.mxu1 %v3066_v18 }
  0x68   : > { %413 = vmatpush1.bf16.msra.mxu0 %v2850_v10 }
  0x69   : > { %414 = vmatprep.subr.bf16.mxu0 %v2851_v11 }
  0x6a   : > { %2624 = vmatpush3.bf16.msra.mxu1 %v2863_v27 }
  0x6b   : > { %2625 = vmatprep.subr.bf16.mxu1 %v3066_v18 }
  0x6c   : > { %415 = vmatpush1.bf16.msra.mxu0 %v2853_v12 }
  0x6d   : > { %416 = vmatprep.subr.bf16.mxu0 %v2854_v13 }
  0x6e   : > { %2626 = vmatpush3.bf16.msra.mxu1 %v2864_v29 }
  0x6f   : > { %2627 = vmatprep.subr.bf16.mxu1 %v3066_v18 }
  0x70   : > { %417 = vmatpush1.bf16.msra.mxu0 %v2856_v14 }
  0x71   : > { %418 = vmatprep.subr.bf16.mxu0 %v2857_v15 }
  0x72   : > { %2628 = vmatpush3.bf16.msra.mxu1 %v2865_v30 }
  0x73   : > { %2629 = vmatprep.subr.bf16.mxu1 %v3066_v18 }
  0x74   : > { %419 = vmatpush1.bf16.msra.mxu0 %v2859_v16 }
  0x75   : > { %2661 = vmatprep.subr.bf16.mxu0 %v3066_v18 }
  0x76   : > { %2630 = vmatpush3.bf16.msra.mxu1 %v2866_v31 }
  0x77   : > { %437 = vmatmul.mubr.bf16.vlgmr.msra.gmra.mxu0 %v243_v17  ;;  %2631 = vmatprep.subr.bf16.mxu1 %v3066_v18 }
  0x78   : > { %2663 = vmatprep.mubr.msk.bf16.mxu0 %vm3074_vm0, %v3066_v18 }
  0x7a   : > { %2632 = vmatpush3.bf16.msra.mxu1 %v2867_v32 }
  0x7b   : > { %2637 = vmatprep.subr.bf16.mxu1 %v3066_v18 }
  0x7d   : > { %2634 = vmatmul.mubr.bf16.vlgmr.msra.gmra.mxu1 %v243_v17 }
  0x7e   : > { %2639 = vmatprep.mubr.msk.bf16.mxu1 %vm3074_vm0, %v3066_v18 }
 0x137   : > { %v438_v22 = vpop.f32.mrf.mxu0 }
 0x138   : > { %v3241_v23 = vpack.c.bf16 %v438_v22, %v438_v22 }
 0x139   : > { %v440_v24 = vpop.f32.mrf.mxu0 }
 0x13a   : > { %492 = vrot.lane.b32.xlu0 %v3241_v23, %s3067_s21  ;;  %489 = vrot.lane.b32.xlu1 %v3241_v23, %s3068_s23  ;;  %v3248_v26 = vpack.c.bf16 %v440_v24, %v440_v24 }
 0x13b   : > { %v442_v25 = vpop.f32.mrf.mxu0 }
 0x13d   : > { %v443_v28 = vpop.f32.mrf.mxu0 }
 0x13e   : > { %495 = vrot.lane.b32.xlu1 %v3241_v23, %s3069_s5  ;;  %611 = vrot.lane.b32.xlu0 %v3248_v26, %s3068_s23 }
 0x142   : > { %617 = vrot.lane.b32.xlu1 %v3248_v26, %s3069_s5  ;;  %614 = vrot.lane.b32.xlu0 %v3248_v26, %s3067_s21 }
 0x146   : > { %620 = vrot.lane.b32.xlu1 %v3248_v26, %s3070_s7  ;;  %623 = vrot.lane.b32.xlu0 %v3248_v26, %s3071_s8 }
 0x14a   : > { %626 = vrot.lane.b32.xlu1 %v3248_v26, %s3072_s9  ;;  %629 = vrot.lane.b32.xlu0 %v3248_v26, %s3073_s14 }
 0x14e   : > { %501 = vrot.lane.b32.xlu1 %v3241_v23, %s3071_s8  ;;  %498 = vrot.lane.b32.xlu0 %v3241_v23, %s3070_s7 }
 0x152   : > { %507 = vrot.lane.b32.xlu1 %v3241_v23, %s3073_s14  ;;  %504 = vrot.lane.b32.xlu0 %v3241_v23, %s3072_s9 }
 0x1ac   : > { %v3285_v33 = vpop.permute.xlu0 %492  ;;  %v3287_v34 = vpop.permute.xlu1 %489 }
 0x1b0   : > { %v3289_v35 = vpop.permute.xlu1 %495  ;;  %v612_v36 = vpop.permute.xlu0 %611 }
 0x1b4   : > { %v618_v40 = vpop.permute.xlu1 %617  ;;  %v615_v41 = vpop.permute.xlu0 %614 }
 0x1b8   : > { %v621_v46 = vpop.permute.xlu1 %620  ;;  %v624_v47 = vpop.permute.xlu0 %623 }
 0x1b9   : > { %v632_v50 = vcombine.low %v3248_v26, %v621_v46  ;;  %v666_v51 = vcombine.low %v612_v36, %v624_v47 }
 0x1bb   : > { %v639_v57 = vrot.slane %v632_v50, %v3291_v49  ;;  %v673_v58 = vrot.slane %v666_v51, %v3291_v49 }
 0x1bc   : > { %v627_v52 = vpop.permute.xlu1 %626  ;;  %v630_v53 = vpop.permute.xlu0 %629 }
 0x1bd   : > { %v640_v54 = vcombine.low %v615_v41, %v627_v52  ;;  %v674_v55 = vcombine.low %v618_v40, %v630_v53 }
 0x1bf   : > { %v647_v59 = vrot.slane %v640_v54, %v3291_v49  ;;  %v681_v60 = vrot.slane %v674_v55, %v3291_v49 }
 0x1c0   : > { %v502_v61 = vpop.permute.xlu1 %501  ;;  %v499_v3 = vpop.permute.xlu0 %498 }
 0x1c1   : > { %v648_v62 = vcombine.low %v639_v57, %v647_v59  ;;  %v649_v63 = vcombine.high %v639_v57, %v647_v59  ;;  %v682_v1 = vcombine.low %v673_v58, %v681_v60  ;;  %v683_v2 = vcombine.high %v673_v58, %v681_v60 }
 0x1c2   : > { %v544_v8 = vcombine.low %v3287_v34, %v502_v61  ;;  %v510_v9 = vcombine.low %v3241_v23, %v499_v3 }
 0x1c3   : > { %v656_v4 = vrot.slane %v648_v62, %v3294_v56  ;;  %v663_v5 = vrot.slane %v649_v63, %v3294_v56  ;;  %v690_v6 = vrot.slane %v682_v1, %v3294_v56  ;;  %v697_v7 = vrot.slane %v683_v2, %v3294_v56 }
 0x1c4   : > { %v508_v19 = vpop.permute.xlu1 %507  ;;  %v505_v25 = vpop.permute.xlu0 %504  ;;  %v551_v40 = vrot.slane %v544_v8, %v3291_v49  ;;  %v517_v42 = vrot.slane %v510_v9, %v3291_v49 }
 0x1c5   : > { %v664_v10 = vcombine.high %v656_v4, %v3065_v0  ;;  %v665_v11 = vcombine.high %v663_v5, %v3065_v0  ;;  %v704_v12 = vshrl.u32 %v656_v4, 16  ;;  %v720_v13 = vshrl.u32 %v663_v5, 16 }
 0x1c6   : > { %v698_v14 = vcombine.high %v690_v6, %v3065_v0  ;;  %v699_v15 = vcombine.high %v697_v7, %v3065_v0  ;;  %v702_v16 = vpack.i.b16 %v690_v6, %v656_v4  ;;  %v705_v17 = vshrl.u32 %v690_v6, 16 }
 0x1c7   : > { %v712_v20 = vshrl.u32 %v664_v10, 16  ;;  %v728_v21 = vshrl.u32 %v665_v11, 16  ;;  %v718_v22 = vpack.i.b16 %v697_v7, %v663_v5  ;;  %v721_v24 = vshrl.u32 %v697_v7, 16 }
 0x1c8   : > { %v706_v26 = vpack.i.b16 %v705_v17, %v704_v12  ;;  %v710_v23 = vpack.i.b16 %v698_v14, %v664_v10  ;;  %v713_v27 = vshrl.u32 %v698_v14, 16  ;;  %v726_v28 = vpack.i.b16 %v699_v15, %v665_v11 }
 0x1c9   : > { %v722_v29 = vpack.i.b16 %v721_v24, %v720_v13  ;;  %v729_v30 = vshrl.u32 %v699_v15, 16  ;;  %v963_v31 = vcombine.low %v702_v16, %v718_v22  ;;  %v552_v32 = vcombine.low %v3289_v35, %v508_v19 }
 0x1ca   : > { %v714_v34 = vpack.i.b16 %v713_v27, %v712_v20  ;;  %v971_v36 = vcombine.low %v710_v23, %v726_v28  ;;  %v518_v37 = vcombine.low %v3285_v33, %v505_v25 }
 0x1cb   : > { %v730_v38 = vpack.i.b16 %v729_v30, %v728_v21  ;;  %v997_v39 = vcombine.low %v706_v26, %v722_v29  ;;  %v559_v41 = vrot.slane %v552_v32, %v3291_v49  ;;  %v970_v35 = vrot.slane %v963_v31, %v3291_v49 }
 0x1cc   : > { %v525_v43 = vrot.slane %v518_v37, %v3291_v49  ;;  %v978_v44 = vrot.slane %v971_v36, %v3291_v49 }
 0x1cd   : > { %v560_v45 = vcombine.low %v551_v40, %v559_v41  ;;  %v561_v46 = vcombine.high %v551_v40, %v559_v41  ;;  %v1005_v47 = vcombine.low %v714_v34, %v730_v38  ;;  %v1004_v53 = vrot.slane %v997_v39, %v3291_v49 }
 0x1ce   : > { %v526_v48 = vcombine.low %v517_v42, %v525_v43  ;;  %v527_v50 = vcombine.high %v517_v42, %v525_v43  ;;  %v979_v52 = vcombine.low %v970_v35, %v978_v44  ;;  %v980_v58 = vcombine.high %v970_v35, %v978_v44 }
 0x1cf   : > { %v568_v33 = vrot.slane %v560_v45, %v3294_v56  ;;  %v575_v51 = vrot.slane %v561_v46, %v3294_v56  ;;  %v1012_v57 = vrot.slane %v1005_v47, %v3291_v49 }
 0x1d0   : > { %v534_v54 = vrot.slane %v526_v48, %v3294_v56  ;;  %v541_v55 = vrot.slane %v527_v50, %v3294_v56  ;;  %v987_v22 = vrot.slane %v979_v52, %v3294_v56  ;;  %v3332_v26 = vrot.slane %v980_v58, %v3294_v56 }
 0x1d1   : > { %v576_v59 = vcombine.high %v568_v33, %v3065_v0  ;;  %v577_v60 = vcombine.high %v575_v51, %v3065_v0  ;;  %v583_v61 = vshrl.u32 %v568_v33, 16  ;;  %v599_v62 = vshrl.u32 %v575_v51, 16 }
 0x1d2   : > { %v542_v63 = vcombine.high %v534_v54, %v3065_v0  ;;  %v543_v1 = vcombine.high %v541_v55, %v3065_v0  ;;  %v580_v2 = vpack.i.b16 %v568_v33, %v534_v54  ;;  %v582_v3 = vshrl.u32 %v534_v54, 16 }
 0x1d3   : > { %v591_v4 = vshrl.u32 %v576_v59, 16  ;;  %v607_v5 = vshrl.u32 %v577_v60, 16  ;;  %v596_v6 = vpack.i.b16 %v575_v51, %v541_v55  ;;  %v598_v7 = vshrl.u32 %v541_v55, 16 }
 0x1d4   : > { %v584_v8 = vpack.i.b16 %v583_v61, %v582_v3  ;;  %v588_v9 = vpack.i.b16 %v576_v59, %v542_v63  ;;  %v590_v10 = vshrl.u32 %v542_v63, 16  ;;  %v604_v11 = vpack.i.b16 %v577_v60, %v543_v1 }
 0x1d5   : > { %v600_v12 = vpack.i.b16 %v599_v62, %v598_v7  ;;  %v606_v13 = vshrl.u32 %v543_v1, 16  ;;  %v871_v14 = vcombine.low %v580_v2, %v596_v6  ;;  %v1013_v15 = vcombine.low %v1004_v53, %v1012_v57 }
 0x1d6   : > { %v592_v16 = vpack.i.b16 %v591_v4, %v590_v10  ;;  %v879_v17 = vcombine.low %v588_v9, %v604_v11  ;;  %v1014_v19 = vcombine.high %v1004_v53, %v1012_v57  ;;  %v1034_v40 = vshrl.u32 %v987_v22, 16 }
 0x1d7   : > { %v608_v20 = vpack.i.b16 %v607_v5, %v606_v13  ;;  %v905_v21 = vcombine.low %v584_v8, %v600_v12  ;;  %v1021_v24 = vrot.slane %v1013_v15, %v3294_v56  ;;  %v878_v27 = vrot.slane %v871_v14, %v3291_v49 }
 0x1d8   : > { %v886_v25 = vrot.slane %v879_v17, %v3291_v49  ;;  %v3335_v23 = vrot.slane %v1014_v19, %v3294_v56  ;;  %v996_v45 = vcombine.high %v3332_v26, %v3065_v0  ;;  %v995_v57 = vcombine.high %v987_v22, %v3065_v0 }
 0x1d9   : > { %v913_v28 = vcombine.low %v592_v16, %v608_v20  ;;  %v1033_v29 = vpack.i.b16 %v1021_v24, %v987_v22  ;;  %v912_v30 = vrot.slane %v905_v21, %v3291_v49  ;;  %v1035_v32 = vshrl.u32 %v1021_v24, 16 }
 0x1da   : > { %v1045_v31 = vpack.i.b16 %v3335_v23, %v3332_v26  ;;  %v887_v34 = vcombine.low %v878_v27, %v886_v25  ;;  %v888_v36 = vcombine.high %v878_v27, %v886_v25  ;;  %v3346_v41 = vcombine.high %v3335_v23, %v3065_v0  ;;  %v479_v27 = vpop.f32.mrf.mxu1 }
 0x1db   : > { %v920_v37 = vrot.slane %v913_v28, %v3291_v49  ;;  %v1152_v38 = vsel %vm1147_vm1, %v1033_v29, 0  ;;  %v1036_v44 = vpack.i.b16 %v1035_v32, %v1034_v40  ;;  %v1029_v53 = vcombine.high %v1021_v24, %v3065_v0 }
 0x1dc   : > { %2638 = vmatpush3.bf16.xpose.msra.mxu1 %v1152_v38  ;;  %v1336_v39 = vsel %vm1147_vm1, %v1045_v31, 0  ;;  %v895_v46 = vrot.slane %v887_v34, %v3294_v56  ;;  %v902_v47 = vrot.slane %v888_v36, %v3294_v56  ;;  %v1051_v50 = vpack.i.b16 %v3346_v41, %v996_v45  ;;  %v2635_v28 = vpop.f32.mrf.mxu1 }
 0x1dd   : > { %2662 = vmatpush3.bf16.xpose.msra.mxu0 %v1336_v39  ;;  %v921_v42 = vcombine.low %v912_v30, %v920_v37  ;;  %2643 = vmatprep.subr.bf16.mxu1 %v3066_v18  ;;  %v922_v43 = vcombine.high %v912_v30, %v920_v37  ;;  %v1198_v52 = vsel %vm1147_vm1, %v1036_v44, 0  ;;  %v1039_v60 = vpack.i.b16 %v1029_v53, %v995_v57 }
 0x1de   : > { %2673 = vmatprep.subr.bf16.mxu0 %v3066_v18  ;;  %v1428_v54 = vsel %vm1147_vm1, %v1051_v50, 0  ;;  %v942_v59 = vshrl.u32 %v895_v46, 16  ;;  %v904_v61 = vcombine.high %v902_v47, %v3065_v0  ;;  %v1041_v2 = vshrl.u32 %v1029_v53, 16  ;;  %v482_v29 = vpop.f32.mrf.mxu1 }
 0x1df   : > { %v929_v35 = vrot.slane %v921_v42, %v3294_v56  ;;  %v936_v48 = vrot.slane %v922_v43, %v3294_v56  ;;  %v1244_v1 = vsel %vm1147_vm1, %v1039_v60, 0  ;;  %v1040_v4 = vshrl.u32 %v995_v57, 16 }
 0x1e0   : > { %v903_v5 = vcombine.high %v895_v46, %v3065_v0  ;;  %v1047_v9 = vshrl.u32 %v3335_v23, 16  ;;  %v1046_v11 = vshrl.u32 %v3332_v26, 16  ;;  %v1053_v16 = vshrl.u32 %v3346_v41, 16  ;;  %v2636_v30 = vpop.f32.mrf.mxu1 }
 0x1e1   : > { %v941_v33 = vpack.i.b16 %v929_v35, %v895_v46  ;;  %v953_v51 = vpack.i.b16 %v936_v48, %v902_v47  ;;  %v943_v55 = vshrl.u32 %v929_v35, 16  ;;  %v938_v58 = vcombine.high %v936_v48, %v3065_v0 }
 0x1e2   : > { %v937_v3 = vcombine.high %v929_v35, %v3065_v0  ;;  %v1042_v6 = vpack.i.b16 %v1041_v2, %v1040_v4  ;;  %v948_v12 = vshrl.u32 %v903_v5, 16  ;;  %v1048_v13 = vpack.i.b16 %v1047_v9, %v1046_v11 }
 0x1e3   : > { %2640 = vmatmul.mubr.msk.bf16.vlgmr.msra.gmra.mxu1 %vm1147_vm1, %v941_v33  ;;  %v944_v62 = vpack.i.b16 %v943_v55, %v942_v59  ;;  %v959_v63 = vpack.i.b16 %v938_v58, %v904_v61  ;;  %v955_v17 = vshrl.u32 %v936_v48, 16  ;;  %v1052_v19 = vshrl.u32 %v996_v45, 16 }
 0x1e4   : > { %2664 = vmatmul.mubr.msk.bf16.vlgmr.msra.gmra.mxu0 %vm1147_vm1, %v953_v51  ;;  %2644 = vmatpush3.bf16.xpose.msra.mxu1 %v1198_v52  ;;  %v947_v7 = vpack.i.b16 %v937_v3, %v903_v5  ;;  %v1290_v8 = vsel %vm1147_vm1, %v1042_v6, 0  ;;  %v949_v10 = vshrl.u32 %v937_v3, 16  ;;  %v1382_v15 = vsel %vm1147_vm1, %v1048_v13, 0 }
 0x1e5   : > { %2674 = vmatpush3.bf16.xpose.msra.mxu0 %v1428_v54  ;;  %2645 = vmatprep.mubr.msk.bf16.mxu1 %vm3074_vm0, %v3066_v18  ;;  %v954_v20 = vshrl.u32 %v902_v47, 16  ;;  %v1054_v21 = vpack.i.b16 %v1053_v16, %v1052_v19  ;;  %v961_v25 = vshrl.u32 %v938_v58, 16  ;;  %v960_v26 = vshrl.u32 %v904_v61, 16 }
 0x1e6   : > { %2675 = vmatprep.mubr.msk.bf16.mxu0 %vm3074_vm0, %v3066_v18  ;;  %2649 = vmatprep.subr.bf16.mxu1 %v3066_v18  ;;  %v950_v14 = vpack.i.b16 %v949_v10, %v948_v12 }
 0x1e7   : > { %2685 = vmatprep.subr.bf16.mxu0 %v3066_v18  ;;  %v956_v22 = vpack.i.b16 %v955_v17, %v954_v20  ;;  %v1474_v24 = vsel %vm1147_vm1, %v1054_v21, 0  ;;  %v962_v23 = vpack.i.b16 %v961_v25, %v960_v26 }
 0x1eb   : > { %2646 = vmatmul.mubr.msk.bf16.vlgmr.msra.gmra.mxu1 %vm1147_vm1, %v944_v62 }
 0x1ec   : > { %2676 = vmatmul.mubr.msk.bf16.vlgmr.msra.gmra.mxu0 %vm1147_vm1, %v959_v63  ;;  %2650 = vmatpush3.bf16.xpose.msra.mxu1 %v1244_v1  ;;  %v3414_v1 = vpack.c.bf16 %v479_v27, %v479_v27 }
 0x1ed   : > { %2651 = vmatprep.mubr.msk.bf16.mxu1 %vm3074_vm0, %v3066_v18  ;;  %2655 = vmatprep.subr.bf16.mxu1 %v3066_v18 }
 0x1ee   : > { %2687 = vmatprep.mubr.msk.bf16.mxu0 %vm3074_vm0, %v3066_v18 }
 0x1f3   : > { %2652 = vmatmul.mubr.msk.bf16.vlgmr.msra.gmra.mxu1 %vm1147_vm1, %v947_v7 }
 0x1f4   : > { %2656 = vmatpush3.bf16.xpose.msra.mxu1 %v1290_v8  ;;  %2657 = vmatprep.mubr.msk.bf16.mxu1 %vm3074_vm0, %v3066_v18 }
 0x1f5   : > { %2667 = vmatprep.subr.bf16.mxu1 %v3066_v18 }
 0x1fb   : > { %2658 = vmatmul.mubr.msk.bf16.vlgmr.msra.gmra.mxu1 %vm1147_vm1, %v950_v14 }
 0x1fc   : > { %2668 = vmatpush3.bf16.xpose.msra.mxu1 %v1382_v15  ;;  %2669 = vmatprep.mubr.msk.bf16.mxu1 %vm3074_vm0, %v3066_v18 }
 0x1fd   : > { %2679 = vmatprep.subr.bf16.mxu1 %v3066_v18 }
 0x203   : > { %2670 = vmatmul.mubr.msk.bf16.vlgmr.msra.gmra.mxu1 %vm1147_vm1, %v956_v22 }
 0x204   : > { %2680 = vmatpush3.bf16.xpose.msra.mxu1 %v1474_v24  ;;  %2681 = vmatprep.mubr.msk.bf16.mxu1 %vm3074_vm0, %v3066_v18 }
 0x205   : > { %2691 = vmatprep.subr.bf16.mxu1 %v3066_v18 }
 0x20b   : > { %2682 = vmatmul.mubr.msk.bf16.vlgmr.msra.gmra.mxu1 %vm1147_vm1, %v962_v23 }
 0x20c   : > { %2693 = vmatprep.mubr.msk.bf16.mxu1 %vm3074_vm0, %v3066_v18 }
 0x2a3   : > { %v1188_v31 = vpop.f32.mrf.mxu1 }
 0x2a4   : > { %v3402_v32 = vpop.f32.mrf.mxu0  ;;  %v1517_v34 = vsel %vm1516_vm2, %v1188_v31, -inf }
 0x2a5   : > { %1518 = vmax.xlane.f32.xlu0 %v1517_v34  ;;  %v2641_v36 = vpop.f32.mrf.mxu1  ;;  %v1529_v48 = vsel %vm1516_vm2, %v3402_v32, -inf }
 0x2a6   : > { %v2665_v37 = vpop.f32.mrf.mxu0 }
 0x2a7   : > { %v1191_v38 = vpop.f32.mrf.mxu1 }
 0x2a8   : > { %v1375_v39 = vpop.f32.mrf.mxu0 }
 0x2a9   : > { %v2642_v40 = vpop.f32.mrf.mxu1 }
 0x2aa   : > { %v2666_v41 = vpop.f32.mrf.mxu0 }
 0x2ab   : > { %v1234_v42 = vpop.f32.mrf.mxu1 }
 0x2ac   : > { %v3405_v43 = vpop.f32.mrf.mxu0  ;;  %v1520_v44 = vsel %vm1516_vm2, %v1234_v42, -inf }
 0x2ad   : > { %1521 = vmax.xlane.f32.xlu1 %v1520_v44  ;;  %v2647_v45 = vpop.f32.mrf.mxu1  ;;  %v1535_v53 = vsel %vm1516_vm2, %v3405_v43, -inf }
 0x2ae   : > { %v2677_v46 = vpop.f32.mrf.mxu0 }
 0x2af   : > { %v1237_v35 = vpop.f32.mrf.mxu1 }
 0x2b0   : > { %v1467_v47 = vpop.f32.mrf.mxu0 }
 0x2b1   : > { %v2648_v50 = vpop.f32.mrf.mxu1  ;;  %1530 = vmax.xlane.f32.xlu1 %v1529_v48 }
 0x2b2   : > { %v2678_v33 = vpop.f32.mrf.mxu0 }
 0x2b3   : > { %v1280_v51 = vpop.f32.mrf.mxu1 }
 0x2b4   : > { %v1523_v52 = vsel %vm1516_vm2, %v1280_v51, -inf }
 0x2b5   : > { %1524 = vmax.xlane.f32.xlu0 %v1523_v52  ;;  %v2653_v54 = vpop.f32.mrf.mxu1  ;;  %1536 = vmax.xlane.f32.xlu1 %v1535_v53 }
 0x2b7   : > { %v1283_v55 = vpop.f32.mrf.mxu1 }
 0x2b9   : > { %v2654_v57 = vpop.f32.mrf.mxu1 }
 0x2bb   : > { %v1326_v58 = vpop.f32.mrf.mxu1 }
 0x2bc   : > { %v1526_v59 = vsel %vm1516_vm2, %v1326_v58, -inf }
 0x2bd   : > { %1527 = vmax.xlane.f32.xlu0 %v1526_v59  ;;  %v2659_v60 = vpop.f32.mrf.mxu1 }
 0x2bf   : > { %v1329_v61 = vpop.f32.mrf.mxu1 }
 0x2c1   : > { %v2660_v62 = vpop.f32.mrf.mxu1 }
 0x2c3   : > { %v1418_v63 = vpop.f32.mrf.mxu1 }
 0x2c4   : > { %v1532_v2 = vsel %vm1516_vm2, %v1418_v63, -inf }
 0x2c5   : > { %1533 = vmax.xlane.f32.xlu0 %v1532_v2  ;;  %v2671_v3 = vpop.f32.mrf.mxu1 }
 0x2c6   : > { %733 = vrot.lane.b32.xlu1 %v3414_v1, %s3068_s23 }
 0x2c7   : > { %v1421_v4 = vpop.f32.mrf.mxu1 }
 0x2c9   : > { %v2672_v5 = vpop.f32.mrf.mxu1 }
 0x2ca   : > { %739 = vrot.lane.b32.xlu1 %v3414_v1, %s3069_s5 }
 0x2cb   : > { %v1510_v6 = vpop.f32.mrf.mxu1 }
 0x2cc   : > { %v1538_v7 = vsel %vm1516_vm2, %v1510_v6, -inf }
 0x2cd   : > { %1539 = vmax.xlane.f32.xlu0 %v1538_v7  ;;  %v2683_v8 = vpop.f32.mrf.mxu1 }
 0x2ce   : > { %742 = vrot.lane.b32.xlu1 %v3414_v1, %s3070_s7 }
 0x2cf   : > { %v1513_v9 = vpop.f32.mrf.mxu1 }
 0x2d1   : > { %v2684_v10 = vpop.f32.mrf.mxu1 }
 0x2d2   : > { %748 = vrot.lane.b32.xlu1 %v3414_v1, %s3072_s9 }
 0x2e3   : > { %736 = vrot.lane.b32.xlu0 %v3414_v1, %s3067_s21 }
 0x2e7   : > { %745 = vrot.lane.b32.xlu0 %v3414_v1, %s3071_s8 }
 0x2eb   : > { %751 = vrot.lane.b32.xlu0 %v3414_v1, %s3073_s14 }
 0x32e   : > { %v1519_v11 = vpop.xlane.xlu0 %1518 }
 0x32f   : > { %v1541_v12 = vsub.f32 %v1188_v31, %v1519_v11 }
 0x331   : > { %v1549_v13 = vmul.f32 1.442695, %v1541_v12 }
 0x333   : > { %2876 = vpow2.f32 %v1549_v13 }
 0x336   : > { %v1522_v14 = vpop.xlane.xlu1 %1521 }
 0x337   : > { %v1542_v15 = vsub.f32 %v1234_v42, %v1522_v14 }
 0x339   : > { %v1551_v16 = vmul.f32 1.442695, %v1542_v15 }
 0x33a   : > { %v1531_v17 = vpop.xlane.xlu1 %1530 }
 0x33b   : > { %2878 = vpow2.f32 %v1551_v16  ;;  %v1545_v19 = vsub.f32 %v3402_v32, %v1531_v17 }
 0x33d   : > { %v1557_v25 = vmul.f32 1.442695, %v1545_v19 }
 0x33e   : > { %v1525_v20 = vpop.xlane.xlu0 %1524  ;;  %v1537_v21 = vpop.xlane.xlu1 %1536 }
 0x33f   : > { %v1543_v22 = vsub.f32 %v1280_v51, %v1525_v20  ;;  %v1547_v23 = vsub.f32 %v3405_v43, %v1537_v21 }
 0x340   : > { %v3433_v24 = vpop.eup %2876 }
 0x341   : > { %v1553_v26 = vmul.f32 1.442695, %v1543_v22  ;;  %v1565_v27 = vsel %vm1516_vm2, %v3433_v24, 0.0  ;;  %v1561_v28 = vmul.f32 1.442695, %v1547_v23 }
 0x342   : > { %1566 = vadd.xlane.f32.xlu1 %v1565_v27  ;;  %v734_v32 = vpop.permute.xlu1 %733 }
 0x343   : > { %2880 = vpow2.f32 %v1553_v26 }
 0x344   : > { %2882 = vpow2.f32 %v1557_v25 }
 0x345   : > { %2884 = vpow2.f32 %v1561_v28 }
 0x346   : > { %v1528_v29 = vpop.xlane.xlu0 %1527  ;;  %v740_v37 = vpop.permute.xlu1 %739 }
 0x347   : > { %v1544_v30 = vsub.f32 %v1326_v58, %v1528_v29 }
 0x348   : > { %v3438_v31 = vpop.eup %2878 }
 0x349   : > { %v1555_v34 = vmul.f32 1.442695, %v1544_v30  ;;  %v1568_v36 = vsel %vm1516_vm2, %v3438_v31, 0.0 }
 0x34a   : > { %1569 = vadd.xlane.f32.xlu0 %v1568_v36  ;;  %v743_v44 = vpop.permute.xlu1 %742 }
 0x34b   : > { %2886 = vpow2.f32 %v1555_v34  ;;  %v754_v54 = vcombine.low %v3414_v1, %v743_v44 }
 0x34d   : > { %v761_v59 = vrot.slane %v754_v54, %v3291_v49 }
 0x34e   : > { %v1534_v38 = vpop.xlane.xlu0 %1533  ;;  %v749_v52 = vpop.permute.xlu1 %748 }
 0x34f   : > { %v1546_v39 = vsub.f32 %v1418_v63, %v1534_v38 }
 0x350   : > { %v3442_v40 = vpop.eup %2880 }
 0x351   : > { %v1559_v41 = vmul.f32 1.442695, %v1546_v39  ;;  %v1571_v42 = vsel %vm1516_vm2, %v3442_v40, 0.0  ;;  %v3446_v43 = vpop.eup %2882 }
 0x352   : > { %1572 = vadd.xlane.f32.xlu0 %v1571_v42  ;;  %v1577_v45 = vsel %vm1516_vm2, %v3446_v43, 0.0  ;;  %v3450_v46 = vpop.eup %2884 }
 0x353   : > { %2888 = vpow2.f32 %v1559_v41  ;;  %v1583_v51 = vsel %vm1516_vm2, %v3450_v46, 0.0 }
 0x356   : > { %v1540_v35 = vpop.xlane.xlu0 %1539  ;;  %1578 = vadd.xlane.f32.xlu0 %v1577_v45 }
 0x357   : > { %v1548_v47 = vsub.f32 %v1510_v6, %v1540_v35 }
 0x358   : > { %v3452_v48 = vpop.eup %2886 }
 0x359   : > { %v1563_v50 = vmul.f32 1.442695, %v1548_v47  ;;  %v1574_v33 = vsel %vm1516_vm2, %v3452_v48, 0.0 }
 0x35a   : > { %v737_v53 = vpop.permute.xlu0 %736  ;;  %1575 = vadd.xlane.f32.xlu1 %v1574_v33  ;;  %1584 = vadd.xlane.f32.xlu0 %v1583_v51 }
 0x35b   : > { %2890 = vpow2.f32 %v1563_v50  ;;  %v762_v55 = vcombine.low %v737_v53, %v749_v52 }
 0x35d   : > { %v769_v57 = vrot.slane %v762_v55, %v3291_v49 }
 0x35e   : > { %v746_v58 = vpop.permute.xlu0 %745 }
 0x35f   : > { %v770_v61 = vcombine.low %v761_v59, %v769_v57  ;;  %v788_v63 = vcombine.low %v734_v32, %v746_v58  ;;  %v771_v3 = vcombine.high %v761_v59, %v769_v57 }
 0x360   : > { %v3461_v60 = vpop.eup %2888 }
 0x361   : > { %v1580_v62 = vsel %vm1516_vm2, %v3461_v60, 0.0  ;;  %v778_v1 = vrot.slane %v770_v61, %v3294_v56  ;;  %v795_v5 = vrot.slane %v788_v63, %v3291_v49  ;;  %v785_v7 = vrot.slane %v771_v3, %v3294_v56 }
 0x362   : > { %v752_v2 = vpop.permute.xlu0 %751  ;;  %1581 = vadd.xlane.f32.xlu1 %v1580_v62 }
 0x363   : > { %v796_v4 = vcombine.low %v740_v37, %v752_v2  ;;  %v786_v11 = vcombine.high %v778_v1, %v3065_v0  ;;  %v787_v15 = vcombine.high %v785_v7, %v3065_v0  ;;  %v826_v16 = vshrl.u32 %v778_v1, 16 }
 0x364   : > { %v842_v25 = vshrl.u32 %v785_v7, 16 }
 0x365   : > { %v803_v6 = vrot.slane %v796_v4, %v3291_v49  ;;  %v834_v22 = vshrl.u32 %v786_v11, 16  ;;  %v850_v32 = vshrl.u32 %v787_v15, 16 }
 0x367   : > { %v804_v9 = vcombine.low %v795_v5, %v803_v6  ;;  %v805_v10 = vcombine.high %v795_v5, %v803_v6 }
 0x368   : > { %v3469_v8 = vpop.eup %2890 }
 0x369   : > { %v1586_v12 = vsel %vm1516_vm2, %v3469_v8, 0.0  ;;  %v812_v13 = vrot.slane %v804_v9, %v3294_v56  ;;  %v819_v14 = vrot.slane %v805_v10, %v3294_v56 }
 0x36a   : > { %1587 = vadd.xlane.f32.xlu1 %v1586_v12 }
 0x36b   : > { %v820_v17 = vcombine.high %v812_v13, %v3065_v0  ;;  %v821_v19 = vcombine.high %v819_v14, %v3065_v0  ;;  %v824_v20 = vpack.i.b16 %v812_v13, %v778_v1  ;;  %v827_v21 = vshrl.u32 %v812_v13, 16 }
 0x36c   : > { %v840_v26 = vpack.i.b16 %v819_v14, %v785_v7  ;;  %v843_v23 = vshrl.u32 %v819_v14, 16 }
 0x36d   : > { %v828_v27 = vpack.i.b16 %v827_v21, %v826_v16  ;;  %v832_v28 = vpack.i.b16 %v820_v17, %v786_v11  ;;  %v835_v29 = vshrl.u32 %v820_v17, 16  ;;  %v848_v30 = vpack.i.b16 %v821_v19, %v787_v15 }
 0x36e   : > { %v844_v34 = vpack.i.b16 %v843_v23, %v842_v25  ;;  %v851_v36 = vshrl.u32 %v821_v19, 16  ;;  %v1055_v37 = vcombine.low %v824_v20, %v840_v26 }
 0x36f   : > { %v836_v38 = vpack.i.b16 %v835_v29, %v834_v22  ;;  %v1063_v39 = vcombine.low %v832_v28, %v848_v30 }
 0x370   : > { %v852_v41 = vpack.i.b16 %v851_v36, %v850_v32  ;;  %v1089_v42 = vcombine.low %v828_v27, %v844_v34  ;;  %v1062_v44 = vrot.slane %v1055_v37, %v3291_v49 }
 0x371   : > { %v1070_v45 = vrot.slane %v1063_v39, %v3291_v49 }
 0x372   : > { %v1097_v35 = vcombine.low %v836_v38, %v852_v41  ;;  %v1096_v33 = vrot.slane %v1089_v42, %v3291_v49 }
 0x373   : > { %v1071_v47 = vcombine.low %v1062_v44, %v1070_v45  ;;  %v1072_v50 = vcombine.high %v1062_v44, %v1070_v45 }
 0x374   : > { %v1104_v51 = vrot.slane %v1097_v35, %v3291_v49 }
 0x375   : > { %v1079_v52 = vrot.slane %v1071_v47, %v3294_v56  ;;  %v1086_v53 = vrot.slane %v1072_v50, %v3294_v56 }
 0x376   : > { %v1105_v54 = vcombine.low %v1096_v33, %v1104_v51  ;;  %v1106_v55 = vcombine.high %v1096_v33, %v1104_v51 }
 0x377   : > { %v1087_v57 = vcombine.high %v1079_v52, %v3065_v0  ;;  %v1088_v58 = vcombine.high %v1086_v53, %v3065_v0  ;;  %v1126_v62 = vshrl.u32 %v1079_v52, 16  ;;  %v1138_v63 = vshrl.u32 %v1086_v53, 16 }
 0x378   : > { %v1113_v59 = vrot.slane %v1105_v54, %v3294_v56  ;;  %v1120_v61 = vrot.slane %v1106_v55, %v3294_v56 }
 0x379   : > { %v1132_v5 = vshrl.u32 %v1087_v57, 16  ;;  %v1144_v9 = vshrl.u32 %v1088_v58, 16 }
 0x37a   : > { %v1125_v2 = vpack.i.b16 %v1113_v59, %v1079_v52  ;;  %v1127_v3 = vshrl.u32 %v1113_v59, 16  ;;  %v1121_v4 = vcombine.high %v1113_v59, %v3065_v0  ;;  %v1137_v1 = vpack.i.b16 %v1120_v61, %v1086_v53 }
 0x37b   : > { %v1139_v6 = vshrl.u32 %v1120_v61, 16  ;;  %v1122_v7 = vcombine.high %v1120_v61, %v3065_v0  ;;  %v2869_v61 = vld [vmem:[#allocation7 + $0x30] sm:$0xff]  }
 0x37c   : > { %v1618_v10 = vsel %vm1616_vm3, %v1125_v2, 0  ;;  %v1128_v11 = vpack.i.b16 %v1127_v3, %v1126_v62  ;;  %v1131_v12 = vpack.i.b16 %v1121_v4, %v1087_v57  ;;  %v1133_v13 = vshrl.u32 %v1121_v4, 16 }
 0x37d   : > { %2686 = vmatpush3.bf16.msra.mxu0 %v1618_v10  ;;  %v1802_v14 = vsel %vm1616_vm3, %v1137_v1, 0  ;;  %v1140_v15 = vpack.i.b16 %v1139_v6, %v1138_v63  ;;  %v1143_v16 = vpack.i.b16 %v1122_v7, %v1088_v58  ;;  %v1145_v17 = vshrl.u32 %v1122_v7, 16 }
 0x37e   : > { %v1664_v19 = vsel %vm1616_vm3, %v1128_v11, 0  ;;  %2697 = vmatprep.subr.bf16.mxu0 %v3066_v18  ;;  %v1710_v20 = vsel %vm1616_vm3, %v1131_v12, 0  ;;  %v1134_v21 = vpack.i.b16 %v1133_v13, %v1132_v5 }
 0x37f   : > { %2692 = vmatpush3.bf16.msra.mxu1 %v1664_v19  ;;  %v1848_v0 = vsel %vm1616_vm3, %v1140_v15, 0  ;;  %v1894_v22 = vsel %vm1616_vm3, %v1143_v16, 0  ;;  %v1146_v25 = vpack.i.b16 %v1145_v17, %v1144_v9 }
 0x380   : > { %2703 = vmatprep.subr.bf16.mxu1 %v3066_v18  ;;  %v1756_v26 = vsel %vm1616_vm3, %v1134_v21, 0 }
 0x381   : > { %v1940_v23 = vsel %vm1616_vm3, %v1146_v25, 0 }
 0x3cb   : > { %v1567_v27 = vpop.xlane.xlu1 %1566 }
 0x3cc   : > { %2892 = vrcp.f32 %v1567_v27 }
 0x3d3   : > { %v1570_v28 = vpop.xlane.xlu0 %1569 }
 0x3d4   : > { %2894 = vrcp.f32 %v1570_v28 }
 0x3d9   : > { %v2893_v29 = vpop.eup %2892 }
 0x3da   : > { %v1597_v30 = vmul.f32 %v2893_v29, %v3433_v24 }
 0x3db   : > { %v1573_v32 = vpop.xlane.xlu0 %1572 }
 0x3dc   : > { %2896 = vrcp.f32 %v1573_v32  ;;  %v1605_v34 = vpack.c.bf16 %v1597_v30, %v1597_v30 }
 0x3de   : > { %2688 = vmatmul.mubr.msk.bf16.vlgmr.msra.gmra.mxu0 %vm1516_vm2, %v1605_v34  ;;  %v2870_v34 = vld [vmem:[#allocation7 + $0x28] sm:$0xff]  }
 0x3df   : > { %2698 = vmatpush3.bf16.msra.mxu0 %v1710_v20  ;;  %v1579_v36 = vpop.xlane.xlu0 %1578  ;;  %2699 = vmatprep.mubr.msk.bf16.mxu0 %vm3074_vm0, %v3066_v18 }
 0x3e0   : > { %2898 = vrcp.f32 %v1579_v36  ;;  %2709 = vmatprep.subr.bf16.mxu0 %v3066_v18 }
 0x3e1   : > { %v2895_v37 = vpop.eup %2894 }
 0x3e2   : > { %v1598_v38 = vmul.f32 %v2895_v37, %v3438_v31 }
 0x3e3   : > { %v1576_v39 = vpop.xlane.xlu1 %1575  ;;  %v1585_v42 = vpop.xlane.xlu0 %1584 }
 0x3e4   : > { %v1606_v41 = vpack.c.bf16 %v1598_v38, %v1598_v38  ;;  %2900 = vrcp.f32 %v1576_v39 }
 0x3e5   : > { %2902 = vrcp.f32 %v1585_v42 }
 0x3e6   : > { %2694 = vmatmul.mubr.msk.bf16.vlgmr.msra.gmra.mxu1 %vm1516_vm2, %v1606_v41 }
 0x3e7   : > { %2704 = vmatpush3.bf16.msra.mxu1 %v1756_v26  ;;  %2705 = vmatprep.mubr.msk.bf16.mxu1 %vm3074_vm0, %v3066_v18 }
 0x3e8   : > { %2715 = vmatprep.subr.bf16.mxu1 %v3066_v18 }
 0x3e9   : > { %v2897_v24 = vpop.eup %2896 }
 0x3ea   : > { %v1599_v44 = vmul.f32 %v2897_v24, %v3442_v40 }
 0x3eb   : > { %v1582_v45 = vpop.xlane.xlu1 %1581 }
 0x3ec   : > { %2904 = vrcp.f32 %v1582_v45  ;;  %v1607_v35 = vpack.c.bf16 %v1599_v44, %v1599_v44 }
 0x3ed   : > { %v2899_v31 = vpop.eup %2898 }
 0x3ee   : > { %2700 = vmatmul.mubr.msk.bf16.vlgmr.msra.gmra.mxu0 %vm1516_vm2, %v1607_v35  ;;  %v1601_v47 = vmul.f32 %v2899_v31, %v3446_v43 }
 0x3ef   : > { %2710 = vmatpush3.bf16.msra.mxu0 %v1802_v14  ;;  %2711 = vmatprep.mubr.msk.bf16.mxu0 %vm3074_vm0, %v3066_v18 }
 0x3f0   : > { %2721 = vmatprep.subr.bf16.mxu0 %v3066_v18  ;;  %v1609_v40 = vpack.c.bf16 %v1601_v47, %v1601_v47 }
 0x3f1   : > { %v2901_v50 = vpop.eup %2900 }
 0x3f2   : > { %v1600_v51 = vmul.f32 %v2901_v50, %v3452_v48  ;;  %v2903_v52 = vpop.eup %2902  ;;  %v2871_v50 = vld [vmem:[#allocation7 + $0x20] sm:$0xff]  }
 0x3f3   : > { %v1588_v33 = vpop.xlane.xlu1 %1587  ;;  %v1603_v54 = vmul.f32 %v2903_v52, %v3450_v46 }
 0x3f4   : > { %2906 = vrcp.f32 %v1588_v33  ;;  %v1608_v53 = vpack.c.bf16 %v1600_v51, %v1600_v51 }
 0x3f5   : > { %v1611_v57 = vpack.c.bf16 %v1603_v54, %v1603_v54 }
 0x3f6   : > { %2712 = vmatmul.mubr.msk.bf16.vlgmr.msra.gmra.mxu0 %vm1516_vm2, %v1609_v40  ;;  %2706 = vmatmul.mubr.msk.bf16.vlgmr.msra.gmra.mxu1 %vm1516_vm2, %v1608_v53 }
 0x3f7   : > { %2722 = vmatpush3.bf16.msra.mxu0 %v1894_v22  ;;  %2716 = vmatpush3.bf16.msra.mxu1 %v1848_v0 }
 0x3f8   : > { %2717 = vmatprep.mubr.msk.bf16.mxu1 %vm3074_vm0, %v3066_v18  ;;  %2723 = vmatprep.mubr.msk.bf16.mxu0 %vm3074_vm0, %v3066_v18 }
 0x3f9   : > { %v2905_v43 = vpop.eup %2904  ;;  %2727 = vmatprep.subr.bf16.mxu1 %v3066_v18  ;;  %2733 = vmatprep.subr.bf16.mxu0 %v3066_v18 }
 0x3fa   : > { %v1602_v48 = vmul.f32 %v2905_v43, %v3461_v60  ;;  %v2868_v60 = vld [vmem:[#allocation7 + $0x38] sm:$0xff]  }
 0x3fb   : > { %v2872_v43 = vld [vmem:[#allocation7 + $0x18] sm:$0xff]  }
 0x3fc   : > { %v1610_v55 = vpack.c.bf16 %v1602_v48, %v1602_v48 }
 0x3fe   : > { %2724 = vmatmul.mubr.msk.bf16.vlgmr.msra.gmra.mxu0 %vm1516_vm2, %v1611_v57  ;;  %2718 = vmatmul.mubr.msk.bf16.vlgmr.msra.gmra.mxu1 %vm1516_vm2, %v1610_v55 }
 0x3ff   : > { %2749 = vmatprep.mubr.msk.bf16.mxu0 %vm3074_vm0, %v3066_v18  ;;  %2728 = vmatpush3.bf16.msra.mxu1 %v1940_v23 }
 0x400   : > { %2729 = vmatprep.mubr.msk.bf16.mxu1 %vm3074_vm0, %v3066_v18  ;;  %2734 = vmatpush3.bf16.msra.mxu0 %v2868_v60 }
 0x401   : > { %v2907_v46 = vpop.eup %2906  ;;  %2735 = vmatprep.subr.bf16.mxu0 %v3066_v18 }
 0x402   : > { %v1604_v58 = vmul.f32 %v2907_v46, %v3469_v8 }
 0x404   : > { %v1612_v59 = vpack.c.bf16 %v1604_v58, %v1604_v58  ;;  %2736 = vmatpush3.bf16.msra.mxu0 %v2869_v61 }
 0x405   : > { %2737 = vmatprep.subr.bf16.mxu0 %v3066_v18 }
 0x406   : > { %2730 = vmatmul.mubr.msk.bf16.vlgmr.msra.gmra.mxu1 %vm1516_vm2, %v1612_v59 }
 0x408   : > { %2738 = vmatpush3.bf16.msra.mxu0 %v2870_v34 }
 0x409   : > { %2739 = vmatprep.subr.bf16.mxu0 %v3066_v18 }
 0x40c   : > { %2740 = vmatpush3.bf16.msra.mxu0 %v2871_v50 }
 0x40d   : > { %2741 = vmatprep.subr.bf16.mxu0 %v3066_v18 }
 0x410   : > { %2742 = vmatpush3.bf16.msra.mxu0 %v2872_v43 }
 0x411   : > { %2743 = vmatprep.subr.bf16.mxu0 %v3066_v18 }
 0x49e   : > { %v1654_v62 = vpop.f32.mrf.mxu0 }
 0x4a0   : > { %v2689_v63 = vpop.f32.mrf.mxu0 }
 0x4a2   : > { %v1657_v2 = vpop.f32.mrf.mxu0 }
 0x4a4   : > { %v2690_v3 = vpop.f32.mrf.mxu0 }
 0x4a6   : > { %v1700_v4 = vpop.f32.mrf.mxu1 }
 0x4a8   : > { %v2695_v1 = vpop.f32.mrf.mxu1 }
 0x4a9   : > { %v2873_v1 = vld [vmem:[#allocation7 + $0x10] sm:$0xff]  }
 0x4aa   : > { %v1703_v5 = vpop.f32.mrf.mxu1  ;;  %2744 = vmatpush3.bf16.msra.mxu0 %v2873_v1 }
 0x4ab   : > { %2745 = vmatprep.subr.bf16.mxu0 %v3066_v18 }
 0x4ac   : > { %v2696_v6 = vpop.f32.mrf.mxu1 }
 0x4ae   : > { %v1746_v8 = vpop.f32.mrf.mxu0 }
 0x4af   : > { %v1982_v11 = vcombine.low %v1654_v62, %v1746_v8  ;;  %v1983_v12 = vcombine.high %v1654_v62, %v1746_v8 }
 0x4b0   : > { %v2701_v7 = vpop.f32.mrf.mxu0 }
 0x4b1   : > { %v1990_v20 = vrot.slane %v1982_v11, %v3291_v49  ;;  %v1997_v21 = vrot.slane %v1983_v12, %v3291_v49 }
 0x4b2   : > { %v1749_v9 = vpop.f32.mrf.mxu0 }
 0x4b4   : > { %v2702_v10 = vpop.f32.mrf.mxu0 }
 0x4b6   : > { %v3538_v13 = vpop.f32.mrf.mxu0  ;;  %v1792_v14 = vpop.f32.mrf.mxu1 }
 0x4b7   : > { %v1998_v15 = vcombine.low %v1700_v4, %v1792_v14  ;;  %v1999_v16 = vcombine.high %v1700_v4, %v1792_v14 }
 0x4b8   : > { %v2713_v17 = vpop.f32.mrf.mxu0  ;;  %v2707_v19 = vpop.f32.mrf.mxu1 }
 0x4b9   : > { %v2006_v0 = vrot.slane %v1998_v15, %v3291_v49  ;;  %v2013_v22 = vrot.slane %v1999_v16, %v3291_v49 }
 0x4ba   : > { %v1841_v25 = vpop.f32.mrf.mxu0  ;;  %v1795_v26 = vpop.f32.mrf.mxu1 }
 0x4bb   : > { %v2046_v23 = vcombine.low %v1990_v20, %v2006_v0  ;;  %v2047_v27 = vcombine.high %v1990_v20, %v2006_v0  ;;  %v2062_v28 = vcombine.low %v1997_v21, %v2013_v22  ;;  %v2063_v29 = vcombine.high %v1997_v21, %v2013_v22  ;;  %v2874_v22 = vld [vmem:[#allocation7 + $0x8] sm:$0xff]  }
 0x4bc   : > { %v2714_v30 = vpop.f32.mrf.mxu0  ;;  %v2708_v32 = vpop.f32.mrf.mxu1  ;;  %2746 = vmatpush3.bf16.msra.mxu0 %v2874_v22 }
 0x4bd   : > { %v2054_v36 = vrot.slane %v2046_v23, %v3294_v56  ;;  %v2061_v37 = vrot.slane %v2047_v27, %v3294_v56  ;;  %v2070_v38 = vrot.slane %v2062_v28, %v3294_v56  ;;  %v2077_v39 = vrot.slane %v2063_v29, %v3294_v56  ;;  %2747 = vmatprep.subr.bf16.mxu0 %v3066_v18 }
 0x4be   : > { %v1930_v41 = vpop.f32.mrf.mxu0  ;;  %v1884_v42 = vpop.f32.mrf.mxu1 }
 0x4bf   : > { %v2546_v24 = vcombine.low %v2054_v36, %v2061_v37  ;;  %v2548_v44 = vcombine.high %v2054_v36, %v2061_v37  ;;  %v2550_v45 = vcombine.low %v2070_v38, %v2077_v39  ;;  %v2552_v35 = vcombine.high %v2070_v38, %v2077_v39  ;;  %v2875_v39 = vld [vmem:[#allocation7] sm:$0xff]  }
 0x4c0   : > { %v2725_v31 = vpop.f32.mrf.mxu0  ;;  %v2719_v47 = vpop.f32.mrf.mxu1  ;;  %v2014_v59 = vcombine.low %v3538_v13, %v1930_v41  ;;  %v2015_v60 = vcombine.high %v3538_v13, %v1930_v41  ;;  %2748 = vmatpush3.bf16.msra.mxu0 %v2875_v39 }
 0x4c1   : > { %v2126_v51 = vrot.slane %v2546_v24, %v3291_v49  ;;  %v2142_v40 = vrot.slane %v2548_v44, %v3291_v49  ;;  %v2158_v52 = vrot.slane %v2550_v45, %v3291_v49  ;;  %v2174_v53 = vrot.slane %v2552_v35, %v3291_v49 }
 0x4c2   : > { %v1933_v33 = vpop.f32.mrf.mxu0  ;;  %v1887_v54 = vpop.f32.mrf.mxu1  ;;  %v2022_v9 = vrot.slane %v2014_v59, %v3291_v49  ;;  %v2029_v12 = vrot.slane %v2015_v60, %v3291_v49 }
 0x4c3   : > { %v2183_v55 = vcombine.high %v2126_v51, %v2142_v40  ;;  %v2215_v57 = vcombine.high %v2158_v52, %v2174_v53  ;;  %v2182_v46 = vcombine.low %v2126_v51, %v2142_v40  ;;  %v2214_v58 = vcombine.low %v2158_v52, %v2174_v53 }
 0x4c4   : > { %v2726_v48 = vpop.f32.mrf.mxu0  ;;  %v2720_v61 = vpop.f32.mrf.mxu1 }
 0x4c5   : > { %v2197_v62 = vrot.slane %v2183_v55, %v3294_v56  ;;  %v2229_v63 = vrot.slane %v2215_v57, %v3294_v56  ;;  %v3559_v2 = vrot.slane %v2182_v46, %v3294_v56  ;;  %v3562_v3 = vrot.slane %v2214_v58, %v3294_v56 }
 0x4c6   : > { %v1976_v4 = vpop.f32.mrf.mxu1 }
 0x4c7   : > { %v2030_v5 = vcombine.low %v1884_v42, %v1976_v4  ;;  %v2031_v6 = vcombine.high %v1884_v42, %v1976_v4  ;;  %v2248_v8 = vcombine.low %v2197_v62, %v2229_v63  ;;  %v2247_v7 = vcombine.high %v3559_v2, %v3562_v3 }
 0x4c8   : > { %v2731_v10 = vpop.f32.mrf.mxu1  ;;  %v2246_v11 = vcombine.low %v3559_v2, %v3562_v3  ;;  %v2249_v16 = vcombine.high %v2197_v62, %v2229_v63  ;;  %v2554_v62 = vld [vmem:[%s3649_s3] ss:$0 sm:$0xff] }
 0x4c9   : > { %v2038_v13 = vrot.slane %v2030_v5, %v3291_v49  ;;  %v2045_v14 = vrot.slane %v2031_v6, %v3291_v49  ;;  %2259 = vrot.lane.b32.xlu1 %v2248_v8, %s3072_s9  ;;  %2255 = vrot.lane.b32.xlu0 %v2247_v7, %s3073_s14 }
 0x4ca   : > { %v1979_v15 = vpop.f32.mrf.mxu1 }
 0x4cb   : > { %v2078_v17 = vcombine.low %v2022_v9, %v2038_v13  ;;  %v2079_v19 = vcombine.high %v2022_v9, %v2038_v13  ;;  %v2094_v20 = vcombine.low %v2029_v12, %v2045_v14  ;;  %v2095_v21 = vcombine.high %v2029_v12, %v2045_v14 }
 0x4cc   : > { %v2732_v0 = vpop.f32.mrf.mxu1 }
 0x4cd   : > { %v2086_v25 = vrot.slane %v2078_v17, %v3294_v56  ;;  %v2093_v26 = vrot.slane %v2079_v19, %v3294_v56  ;;  %v2102_v23 = vrot.slane %v2094_v20, %v3294_v56  ;;  %v2109_v27 = vrot.slane %v2095_v21, %v3294_v56  ;;  %2263 = vrot.lane.b32.xlu1 %v2249_v16, %s3071_s8 }
 0x4cf   : > { %v2547_v28 = vcombine.low %v2086_v25, %v2093_v26  ;;  %v2549_v29 = vcombine.high %v2086_v25, %v2093_v26  ;;  %v2551_v30 = vcombine.low %v2102_v23, %v2109_v27  ;;  %v2553_v32 = vcombine.high %v2102_v23, %v2109_v27 }
 0x4d1   : > { %v2133_v34 = vrot.slane %v2547_v28, %v3291_v49  ;;  %v2149_v36 = vrot.slane %v2549_v29, %v3291_v49  ;;  %v2165_v37 = vrot.slane %v2551_v30, %v3291_v49  ;;  %v2181_v38 = vrot.slane %v2553_v32, %v3291_v49 }
 0x4d3   : > { %v2198_v41 = vcombine.low %v2133_v34, %v2149_v36  ;;  %v2230_v42 = vcombine.low %v2165_v37, %v2181_v38  ;;  %v2199_v24 = vcombine.high %v2133_v34, %v2149_v36  ;;  %v2231_v44 = vcombine.high %v2165_v37, %v2181_v38 }
 0x4d5   : > { %v2206_v45 = vrot.slane %v2198_v41, %v3294_v56  ;;  %v2238_v35 = vrot.slane %v2230_v42, %v3294_v56  ;;  %v2213_v47 = vrot.slane %v2199_v24, %v3294_v56  ;;  %v2245_v50 = vrot.slane %v2231_v44, %v3294_v56 }
 0x4d7   : > { %v2251_v31 = vcombine.high %v2206_v45, %v2238_v35  ;;  %v2250_v18 = vcombine.low %v2206_v45, %v2238_v35  ;;  %v2253_v49 = vcombine.high %v2213_v47, %v2245_v50  ;;  %v2252_v33 = vcombine.low %v2213_v47, %v2245_v50 }
 0x4d9   : > { %2271 = vrot.lane.b32.xlu1 %v2251_v31, %s3069_s5  ;;  %2267 = vrot.lane.b32.xlu0 %v2250_v18, %s3070_s7  ;;  %s2992_s5 = sshll.u32 %s3077_s19, 4  ;;  %s2993_s5 = int_to_ptr.vmem [resolvable:$false] %s2992_s5 }
 0x4da   : > { %s2994_s7 = scalar_lea.vmem %s2993_s5, 256  ;;  %p2995_p6 = scmp.lt.s32.totalorder %s3605_s30, %s2993_s5 }
 0x4dd   : > { %2279 = vrot.lane.b32.xlu1 %v2253_v49, %s3068_s23  ;;  %2275 = vrot.lane.b32.xlu0 %v2252_v33, %s3067_s21  ;;  %s2392_s21 = scalar_lea.sflag [#allocation4], %s3221_s6  ;;  %s2988_s23 = scalar_lea.vmem %s3605_s30, 128 }
 0x4de   : > { %p2989_p7 = scmp.ne.s32.totalorder %s3605_s30, %s2988_s23  ;;  %p2996_p12 = scmp.lt.s32.totalorder %s2994_s7, %s2988_s23 }
 0x4e0   : > { %p2990_p1 = pnand %p2989_p7, %p3666_p11  ;;  %p2997_p3 = por %p2996_p12, %p2995_p6 }
 0x4e2   : > { %p2991_p2 = pneg %p2990_p1 }
 0x4e4   : > { %p2998_p9 = pnand %p2997_p3, %p2991_p2 }
 0x53b   : > { %v2260_v51 = vpop.permute.xlu1 %2259  ;;  %v2256_v40 = vpop.permute.xlu0 %2255 }
 0x53c   : > { %v2282_v52 = vsel %vm1147_vm1, %v2246_v11, %v2256_v40 }
 0x53d   : > { %v2284_v56 = vsel %vm2283_vm4, %v2282_v52, %v2260_v51 }
 0x53f   : > { %v2264_v53 = vpop.permute.xlu1 %2263 }
 0x540   : > { %v2286_v54 = vsel %vm2285_vm5, %v2284_v56, %v2264_v53 }
 0x54b   : > { %v2272_v43 = vpop.permute.xlu1 %2271  ;;  %v2268_v48 = vpop.permute.xlu0 %2267 }
 0x54c   : > { %v2288_v55 = vsel %vm2287_vm6, %v2286_v54, %v2268_v48 }
 0x54d   : > { %v2290_v46 = vsel %vm2289_vm7, %v2288_v55, %v2272_v43 }
 0x54f   : > { %v2280_v57 = vpop.permute.xlu1 %2279  ;;  %v2276_v58 = vpop.permute.xlu0 %2275 }
 0x550   : > { %v2292_v59 = vsel %vm2291_vm8, %v2290_v46, %v2276_v58 }
 0x551   : > { %v2294_v60 = vsel %vm2293_vm9, %v2292_v59, %v2280_v57 }
 0x552   : > { %v2295_v61 = vpack.c.bf16 %v2294_v60, %v2294_v60 }
 0x554   : > { %2750 = vmatmul.mubr.bf16.vlgmr.msra.gmra.mxu0 %v2295_v61 }
 0x614   : > { %v2384_v63 = vpop.f32.mrf.mxu0 }
 0x615   : > { %v2385_v2 = vadd.f32 %v2554_v62, %v2384_v63 }
 0x616   : > { %v2751_v3 = vpop.f32.mrf.mxu0 }
 0x617   : > { %2390 = vst [vmem:[%s241_s29] sm:$0xff] %v2385_v2 }
 0x618   : > { %v2387_v4 = vpop.f32.mrf.mxu0 }
 0x619   : > { %3001 = shalt.err (!%p2998_p9)
}
 0x61a   : > { %s3002_s8 = scalar_lea.hbm %s3603_s12, 128  ;;  %s3006_s14 = scalar_lea.hbm %s3650_s4, 256 }
 0x61b   : > { %p3003_p13 = scmp.ne.s32.totalorder %s3603_s12, %s3002_s8  ;;  %p3007_p0 = scmp.lt.s32.totalorder %s3603_s12, %s3650_s4 }
 0x61c   : > { %p3008_p4 = scmp.lt.s32.totalorder %s3006_s14, %s3002_s8 }
 0x61d   : > { %p3004_p5 = pnand %p3003_p13, %p3666_p11 }
 0x61e   : > { %p3009_p8 = por %p3008_p4, %p3007_p0 }
 0x61f   : > { %p3005_p10 = pneg %p3004_p5 }
 0x621   : > { %p3010_p7 = pnand %p3009_p8, %p3005_p10 }
 0x623   : > { %3013 = shalt.err (!%p3010_p7)
}
 0x624   : > { %2763 = dma.vmem_to_hbm [thread:$0]  (%p3666_p11), %s3605_s30, 128, %s3603_s12, %s2392_s21   ;;  %v2752_v1 = vpop.f32.mrf.mxu0 }
 0x625 PF: > { %s2417_s28 = sand.u32 1, %s3044_s15   ;;  %p3667_p1 = scmp.ne.s32.totalorder %s3656_s22, 0 }
 0x626   : > { %p3668_p2 = scmp.ge.s32.totalorder %s3056_s18, 2  ;;  %s2418_s26 = scalar_lea.sflag [#allocation4], %s2417_s28 }
 0x628   : > { %p2777_p6 = pnand %p3668_p2, %p3667_p1 }
 0x62a   : > { %p2778_p12 = pneg %p2777_p6 }
 0x62c   : > { %3039 = dma.done.wait (%p2778_p12), %s2418_s26, 128  }
 0x62d   : > { %3041 = vsyncadd (%p2778_p12), %s2418_s26, 4294967168  ;;  %p18_p3 = scmp.ge.s32.totalorder %s3175_s13, 4   ;;  %s3669_s15 = smov %s3048_s16 }
 0x62e   : > { %s3670_s16 = smov %s3052_s17  ;;  %s3671_s17 = smov %s3184_s24 }
 0x62f   : > { %s3672_s18 = smov %s3175_s13  ;;  %20 = sbr.rel (!%p18_p3) target bundleno = 6 (0x6), region = 89 }
 0x634   :  { %2423 = vsyncpa [#allocation3], 1 }
 0x635   :  { %2425 = vsyncpa [#allocation3 + $0x1], 1 }
 0x636   :  { %2426 = vsyncpa [#allocation6], 1 }
 0x637   :  { %2427 = vsyncpa [#allocation4], 1 }
 0x638   :  { %2429 = vsyncpa [#allocation4 + $0x1], 1 }

</bundles_post_ra>
